<compile_context>
chip_gen: v5e
topology: v5e:2x2
jax: 0.10.0
libtpu: 0.0.40
codegen_flags: <defaults>
</compile_context>

<pallas_src>
import jax
import jax.numpy as jnp
from jax.experimental import pallas as pl
from jax.experimental.pallas import tpu as pltpu

TILE_B = 128      # batch tile per grid step (multiple of 128 -> MXU-row aligned)
OUT_PAD = 128     # pad the 10-wide output to a lane-dense 128 columns


def _mlp_kernel(x_ref, w1_ref, b1_ref, w2_ref, b2_ref, w3_ref, b3_ref, o_ref):
    # Layer 1: relu(x @ W1 + b1)   (W1 already [in, 512])
    h1 = jnp.dot(x_ref[...], w1_ref[...], preferred_element_type=jnp.float32)
    h1 = jnp.maximum(h1 + b1_ref[...], 0.0).astype(jnp.bfloat16)
    # Layer 2: relu(h1 @ W2 + b2)  (W2 already [512, 256])
    h2 = jnp.dot(h1, w2_ref[...], preferred_element_type=jnp.float32)
    h2 = jnp.maximum(h2 + b2_ref[...], 0.0).astype(jnp.bfloat16)
    # Output layer: h2 @ W3 + b3   (W3 already [256, OUT_PAD], zero-padded cols)
    out = jnp.dot(h2, w3_ref[...], preferred_element_type=jnp.float32)
    o_ref[...] = (out + b3_ref[...]).astype(o_ref.dtype)


def lenet300_100_forward(x, params):
    """x: [B, in_features] f32. params: PyTorch-style Linear weights (W: [out, in])."""
    w1, b1, w2, b2, w3, b3 = (params["w1"], params["b1"], params["w2"],
                              params["b2"], params["w3"], params["b3"])
    B, in_features = x.shape
    out_dim = w3.shape[0]

    # ---- Param prep (one-time, outside the kernel) ----
    # Pre-transpose to [in, out] and cast to bf16 for the MXU.
    w1t = w1.T.astype(jnp.bfloat16)                           # [in, 512]
    w2t = w2.T.astype(jnp.bfloat16)                           # [512, 256]
    w3_pad = jnp.zeros((OUT_PAD, w3.shape[1]), w3.dtype).at[:out_dim].set(w3)
    w3t = w3_pad.T.astype(jnp.bfloat16)                       # [256, OUT_PAD]
    b1r = b1.reshape(1, -1).astype(jnp.float32)               # [1, 512]
    b2r = b2.reshape(1, -1).astype(jnp.float32)               # [1, 256]
    b3r = jnp.zeros((1, OUT_PAD), jnp.float32).at[0, :out_dim].set(
        b3.astype(jnp.float32))                                # [1, OUT_PAD]

    # ---- Batch padding + bf16 cast of activations ----
    B_pad = ((B + TILE_B - 1) // TILE_B) * TILE_B
    x_p = x.astype(jnp.bfloat16)
    if B_pad != B:
        x_p = jnp.pad(x_p, ((0, B_pad - B), (0, 0)))

    nb = B_pad // TILE_B
    const2d = lambda a: pl.BlockSpec(a.shape, lambda i: (0, 0))  # VMEM-resident weights

    out_padded = pl.pallas_call(
        _mlp_kernel,
        out_shape=jax.ShapeDtypeStruct((B_pad, OUT_PAD), jnp.float32),
        grid=(nb,),
        in_specs=[
            pl.BlockSpec((TILE_B, in_features), lambda i: (i, 0)),  # x batch tile
            const2d(w1t), const2d(b1r),
            const2d(w2t), const2d(b2r),
            const2d(w3t), const2d(b3r),
        ],
        out_specs=pl.BlockSpec((TILE_B, OUT_PAD), lambda i: (i, 0)),
        compiler_params=pltpu.CompilerParams(
            dimension_semantics=("parallel",)),
    )(x_p, w1t, b1r, w2t, b2r, w3t, b3r)

    # Slice away batch padding and the lane padding of the output layer.
    return out_padded[:B, :out_dim]


def init_params(key, in_features, out_features):
    """Deterministic synthetic init matching nn.Linear shapes (W: [out, in], b: [out])."""
    ks = jax.random.split(key, 6)
    def lin(kw, kb, fan_in, fan_out):
        bound = 1.0 / jnp.sqrt(fan_in)
        w = jax.random.uniform(kw, (fan_out, fan_in), jnp.float32, -bound, bound)
        b = jax.random.uniform(kb, (fan_out,), jnp.float32, -bound, bound)
        return w, b
    w1, b1 = lin(ks[0], ks[1], in_features, 512)
    w2, b2 = lin(ks[2], ks[3], 512, 256)
    w3, b3 = lin(ks[4], ks[5], 256, out_features)
    return {"w1": w1, "b1": b1, "w2": w2, "b2": b2, "w3": w3, "b3": b3}


if __name__ == "__main__":
    key = jax.random.PRNGKey(0)
    in_features, out_features, batch = 256, 10, 8
    k_param, k_x = jax.random.split(key)
    params = init_params(k_param, in_features, out_features)
    x = jax.random.normal(k_x, (batch, in_features), jnp.float32)

    y = lenet300_100_forward(x, params)
    jax.block_until_ready(y)

    # Pure-JAX f32 reference (same math as the PyTorch forward); looser tolerance
    # because the kernel computes with bf16 inputs / f32 accumulation.
    h1 = jnp.maximum(x @ params["w1"].T + params["b1"], 0.0)
    h2 = jnp.maximum(h1 @ params["w2"].T + params["b2"], 0.0)
    y_ref = h2 @ params["w3"].T + params["b3"]
    assert y.shape == (batch, out_features)
    assert jnp.allclose(y, y_ref, atol=3e-2, rtol=3e-2), (
        float(jnp.max(jnp.abs(y - y_ref))))

    print("KERNEL_OK")
</pallas_src>

<mosaic_0001>
module attributes {stable_mosaic.version = 11 : i64} {
  func.func @_mlp_kernel(%arg0: i32, %arg1: memref<128x256xbf16, #tpu.memory_space<vmem>>, %arg2: memref<256x512xbf16, #tpu.memory_space<vmem>>, %arg3: memref<1x512xf32, #tpu.memory_space<vmem>>, %arg4: memref<512x256xbf16, #tpu.memory_space<vmem>>, %arg5: memref<1x256xf32, #tpu.memory_space<vmem>>, %arg6: memref<256x128xbf16, #tpu.memory_space<vmem>>, %arg7: memref<1x128xf32, #tpu.memory_space<vmem>>, %arg8: memref<128x128xf32, #tpu.memory_space<vmem>>) attributes {dimension_semantics = [#tpu.dimension_semantics<parallel>], iteration_bounds = array<i64: 1>, scalar_prefetch = 0 : i64, scratch_operands = 0 : i64, tpu.core_type = #tpu.core_type<tc>, window_params = [{transform_indices = @transform_0, window_bounds = array<i64: 128, 256>}, {pipeline_mode = #tpu.pipeline_mode<synchronous>, transform_indices = @transform_1, window_bounds = array<i64: 256, 512>}, {pipeline_mode = #tpu.pipeline_mode<synchronous>, transform_indices = @transform_2, window_bounds = array<i64: 1, 512>}, {pipeline_mode = #tpu.pipeline_mode<synchronous>, transform_indices = @transform_3, window_bounds = array<i64: 512, 256>}, {pipeline_mode = #tpu.pipeline_mode<synchronous>, transform_indices = @transform_4, window_bounds = array<i64: 1, 256>}, {pipeline_mode = #tpu.pipeline_mode<synchronous>, transform_indices = @transform_5, window_bounds = array<i64: 256, 128>}, {pipeline_mode = #tpu.pipeline_mode<synchronous>, transform_indices = @transform_6, window_bounds = array<i64: 1, 128>}, {transform_indices = @transform_7, window_bounds = array<i64: 128, 128>}]} {
    %c0 = arith.constant 0 : index
    %c0_0 = arith.constant 0 : index
    %0 = vector.load %arg1[%c0, %c0_0] : memref<128x256xbf16, #tpu.memory_space<vmem>>, vector<128x256xbf16>
    %c0_1 = arith.constant 0 : index
    %c0_2 = arith.constant 0 : index
    %1 = vector.load %arg2[%c0_1, %c0_2] : memref<256x512xbf16, #tpu.memory_space<vmem>>, vector<256x512xbf16>
    %cst = arith.constant dense<0.000000e+00> : vector<128x512xf32>
    %2 = tpu.matmul %0, %1, %cst {dimension_numbers = #tpu.dot_dimension_numbers<[1], [0], [0], [1], [0, 0, 1, 1], [], []>} : vector<128x256xbf16>, vector<256x512xbf16>, vector<128x512xf32> -> vector<128x512xf32>
    %c0_3 = arith.constant 0 : index
    %c0_4 = arith.constant 0 : index
    %3 = vector.load %arg3[%c0_3, %c0_4] : memref<1x512xf32, #tpu.memory_space<vmem>>, vector<1x512xf32>
    %4 = vector.broadcast %3 : vector<1x512xf32> to vector<128x512xf32>
    %5 = arith.addf %2, %4 : vector<128x512xf32>
    %cst_5 = arith.constant 0.000000e+00 : f32
    %6 = vector.broadcast %cst_5 : f32 to vector<128x512xf32>
    %7 = arith.maximumf %5, %6 : vector<128x512xf32>
    %8 = arith.truncf %7 : vector<128x512xf32> to vector<128x512xbf16>
    %c0_6 = arith.constant 0 : index
    %c0_7 = arith.constant 0 : index
    %9 = vector.load %arg4[%c0_6, %c0_7] : memref<512x256xbf16, #tpu.memory_space<vmem>>, vector<512x256xbf16>
    %cst_8 = arith.constant dense<0.000000e+00> : vector<128x256xf32>
    %10 = tpu.matmul %8, %9, %cst_8 {dimension_numbers = #tpu.dot_dimension_numbers<[1], [0], [0], [1], [0, 0, 1, 1], [], []>} : vector<128x512xbf16>, vector<512x256xbf16>, vector<128x256xf32> -> vector<128x256xf32>
    %c0_9 = arith.constant 0 : index
    %c0_10 = arith.constant 0 : index
    %11 = vector.load %arg5[%c0_9, %c0_10] : memref<1x256xf32, #tpu.memory_space<vmem>>, vector<1x256xf32>
    %12 = vector.broadcast %11 : vector<1x256xf32> to vector<128x256xf32>
    %13 = arith.addf %10, %12 : vector<128x256xf32>
    %cst_11 = arith.constant 0.000000e+00 : f32
    %14 = vector.broadcast %cst_11 : f32 to vector<128x256xf32>
    %15 = arith.maximumf %13, %14 : vector<128x256xf32>
    %16 = arith.truncf %15 : vector<128x256xf32> to vector<128x256xbf16>
    %c0_12 = arith.constant 0 : index
    %c0_13 = arith.constant 0 : index
    %17 = vector.load %arg6[%c0_12, %c0_13] : memref<256x128xbf16, #tpu.memory_space<vmem>>, vector<256x128xbf16>
    %cst_14 = arith.constant dense<0.000000e+00> : vector<128x128xf32>
    %18 = tpu.matmul %16, %17, %cst_14 {dimension_numbers = #tpu.dot_dimension_numbers<[1], [0], [0], [1], [0, 0, 1, 1], [], []>} : vector<128x256xbf16>, vector<256x128xbf16>, vector<128x128xf32> -> vector<128x128xf32>
    %c0_15 = arith.constant 0 : index
    %c0_16 = arith.constant 0 : index
    %19 = vector.load %arg7[%c0_15, %c0_16] : memref<1x128xf32, #tpu.memory_space<vmem>>, vector<1x128xf32>
    %20 = vector.broadcast %19 : vector<1x128xf32> to vector<128x128xf32>
    %21 = arith.addf %18, %20 : vector<128x128xf32>
    %c0_17 = arith.constant 0 : index
    %c0_18 = arith.constant 0 : index
    %22 = vector.load %arg8[%c0_17, %c0_18] : memref<128x128xf32, #tpu.memory_space<vmem>>, vector<128x128xf32>
    tpu.vector_store %arg8[%c0_17, %c0_18], %21 {strides = array<i32>} : memref<128x128xf32, #tpu.memory_space<vmem>>, vector<128x128xf32>,
    return
  }
  func.func @transform_0(%arg0: i32) -> (i32, i32) {
    %c0_i32 = arith.constant 0 : i32
    %c0_i32_0 = arith.constant 0 : i32
    return %arg0, %c0_i32 : i32, i32
  }
  func.func @transform_1(%arg0: i32) -> (i32, i32) {
    %c0_i32 = arith.constant 0 : i32
    %c0_i32_0 = arith.constant 0 : i32
    %c0_i32_1 = arith.constant 0 : i32
    return %c0_i32, %c0_i32_0 : i32, i32
  }
  func.func @transform_2(%arg0: i32) -> (i32, i32) {
    %c0_i32 = arith.constant 0 : i32
    %c0_i32_0 = arith.constant 0 : i32
    %c0_i32_1 = arith.constant 0 : i32
    return %c0_i32, %c0_i32_0 : i32, i32
  }
  func.func @transform_3(%arg0: i32) -> (i32, i32) {
    %c0_i32 = arith.constant 0 : i32
    %c0_i32_0 = arith.constant 0 : i32
    %c0_i32_1 = arith.constant 0 : i32
    return %c0_i32, %c0_i32_0 : i32, i32
  }
  func.func @transform_4(%arg0: i32) -> (i32, i32) {
    %c0_i32 = arith.constant 0 : i32
    %c0_i32_0 = arith.constant 0 : i32
    %c0_i32_1 = arith.constant 0 : i32
    return %c0_i32, %c0_i32_0 : i32, i32
  }
  func.func @transform_5(%arg0: i32) -> (i32, i32) {
    %c0_i32 = arith.constant 0 : i32
    %c0_i32_0 = arith.constant 0 : i32
    %c0_i32_1 = arith.constant 0 : i32
    return %c0_i32, %c0_i32_0 : i32, i32
  }
  func.func @transform_6(%arg0: i32) -> (i32, i32) {
    %c0_i32 = arith.constant 0 : i32
    %c0_i32_0 = arith.constant 0 : i32
    %c0_i32_1 = arith.constant 0 : i32
    return %c0_i32, %c0_i32_0 : i32, i32
  }
  func.func @transform_7(%arg0: i32) -> (i32, i32) {
    %c0_i32 = arith.constant 0 : i32
    %c0_i32_0 = arith.constant 0 : i32
    return %arg0, %c0_i32 : i32, i32
  }
}

</mosaic_0001>

<bundles_post_ra>
// kernel: tpu_custom_call.1
= control target key start
LH: loop header
LB: loop body
LE: loop exit
PB: predicated region body
PF: predicated region fallthrough
CT: control target
= control target key end

     0   :  { %12 = vsyncpa [#allocation3], 0  ;;  %s3826_s0 = inlined_call_operand.hbm [shape: bf16[128,256], index: 0, kind: input, shape index: {}]   ;;  %s3827_s1 = inlined_call_operand.hbm [shape: bf16[256,512], index: 1, kind: input, shape index: {}]   ;;  %s3828_s2 = inlined_call_operand.hbm [shape: f32[1,512], index: 2, kind: input, shape index: {}]   ;;  %s3829_s3 = inlined_call_operand.hbm [shape: bf16[512,256], index: 3, kind: input, shape index: {}]   ;;  %s3830_s4 = inlined_call_operand.vmem [shape: f32[1,256], index: 4, kind: input, shape index: {}]   ;;  %s3831_s5 = inlined_call_operand.hbm [shape: bf16[256,128], index: 5, kind: input, shape index: {}]   ;;  %s3832_s6 = inlined_call_operand.vmem [shape: f32[1,128], index: 6, kind: input, shape index: {}]   ;;  %s3833_s7 = inlined_call_operand.hbm [shape: f32[128,128], index: 7, kind: output, shape index: {}]  }
   0x1   :  { %13 = vsyncpa [#allocation6], 0 }
   0x2   :  { %14 = vsyncpa [#allocation9], 0  ;;  %s33_s26 = sshll.u32 %s3827_s1, 4  ;;  %s34_s26 = int_to_ptr.hbm [resolvable:$true] %s33_s26 }
   0x3   :  { %15 = vsyncpa [#allocation4], 0  ;;  %s3159_s27 = smov [#allocation5]   ;;  %s3160_s29 = smov 256  }
   0x4   :  { %s35_s28 = sshll.u32 %s3159_s27, 4  ;;  %s3161_s30 = smov 16   ;;  %s36_s28 = int_to_ptr.vmem [resolvable:$true] %s35_s28 }
   0x5   :  { %41 = dma.hbm_to_vmem [thread:$0]  %s34_s26, 8192, %s36_s28, [#allocation6], %s3160_s29, %s3160_s29, %s3161_s30  }
   0x6   :  { %s57_s10 = sshll.u32 %s3829_s3, 4  ;;  %s3162_s11 = smov [#allocation8]   ;;  %s58_s10 = int_to_ptr.hbm [resolvable:$true] %s57_s10 }
   0x7   :  { %s59_s12 = sshll.u32 %s3162_s11, 4  ;;  %s20_s15 = sshll.u32 %s3826_s0, 4  ;;  %s60_s12 = int_to_ptr.vmem [resolvable:$true] %s59_s12  ;;  %s21_s15 = int_to_ptr.hbm [resolvable:$true] %s20_s15 }
   0x8   :  { %s3163_s1 = smov 128   ;;  %s3164_s16 = smov 8  }
   0x9   :  { %65 = dma.hbm_to_vmem [thread:$0]  %s58_s10, 8192, %s60_s12, [#allocation9], %s3163_s1, %s3163_s1, %s3164_s16  }
   0xa   :  { %s47_s19 = sshll.u32 %s3828_s2, 4  ;;  %s3165_s3 = smov [#allocation2]   ;;  %s48_s19 = int_to_ptr.hbm [resolvable:$true] %s47_s19 }
   0xb   :  { %s22_s20 = sshll.u32 %s3165_s3, 4  ;;  %s3166_s0 = smov [#allocation7]   ;;  %s23_s20 = int_to_ptr.vmem [resolvable:$true] %s22_s20 }
   0xc   :  { %28 = dma.hbm_to_vmem [thread:$0]  %s21_s15, 2048, %s23_s20, [#allocation3], %s3163_s1, %s3163_s1, %s3164_s16  }
   0xd   :  { %s49_s21 = sshll.u32 %s3166_s0, 4  ;;  %s72_s24 = sshll.u32 %s3831_s5, 4  ;;  %s50_s21 = int_to_ptr.vmem [resolvable:$true] %s49_s21  ;;  %s73_s24 = int_to_ptr.hbm [resolvable:$true] %s72_s24 }
   0xe   :  { %52 = dma.hbm_to_vmem [thread:$0]  %s48_s19, 64, %s50_s21, [#allocation6]  }
   0xf   :  { %s3167_s25 = smov [#allocation10]   ;;  %s3168_s2 = smov 64  }
  0x10   :  { %s74_s26 = sshll.u32 %s3167_s25, 4  ;;  %s3169_s27 = smov 4   ;;  %s75_s26 = int_to_ptr.vmem [resolvable:$true] %s74_s26 }
  0x11   :  { %80 = dma.hbm_to_vmem [thread:$0]  %s73_s24, 2048, %s75_s26, [#allocation9], %s3168_s2, %s3168_s2, %s3169_s27  }
  0x12   :  { %3151 = dma.done.wait [#allocation3], 2048  }
  0x13   :  { %3152 = vsyncadd [#allocation3], 4294965248 }
  0x14   :  { %3153 = dma.done.wait [#allocation6], 8256  }
  0x15   :  { %3154 = vsyncadd [#allocation6], 4294959040 }
  0x16   :  { %3155 = dma.done.wait [#allocation9], 10240  }
  0x17   :  { %3156 = vsyncadd [#allocation9], 4294957056  ;;  %v2356_v0 = vld [vmem:[#allocation5 + $0xe0] sm:$0xf]  ;;  %v2864_v1 = vld [vmem:[#allocation5 + $0xec] sm:$0xf0] }
  0x18   :  { %v2484_v2 = vld [vmem:[#allocation5 + $0x1e0] sm:$0xf]  ;;  %v2357_v3 = vor.u32 %v2864_v1, %v2356_v0  ;;  %v2896_v4 = vld [vmem:[#allocation5 + $0x1ec] sm:$0xf0]  ;;  %v2862_v46 = vld [vmem:[#allocation5 + $0xe4] sm:$0xf] }
  0x19   :  { %v2340_v5 = vld [vmem:[#allocation5 + $0xc0] sm:$0xf]  ;;  %v2860_v6 = vld [vmem:[#allocation5 + $0xcc] sm:$0xf0]  ;;  %v2485_v7 = vor.u32 %v2896_v4, %v2484_v2  ;;  %v2358_v47 = vld [vmem:[#allocation5 + $0xf0] sm:$0xf0] }
  0x1a   :  { %v2468_v8 = vld [vmem:[#allocation5 + $0x1c0] sm:$0xf]  ;;  %v2892_v9 = vld [vmem:[#allocation5 + $0x1cc] sm:$0xf0]  ;;  %593 = vmatpush.bf16.msra.mxu0 %v2357_v3  ;;  %2978 = vmatpush.bf16.msra.mxu2 %v2357_v3  ;;  %v2341_v10 = vor.u32 %v2860_v6, %v2340_v5  ;;  %v2894_v49 = vld [vmem:[#allocation5 + $0x1e4] sm:$0xf]  ;;  %v2361_v58 = vor.u32 %v2862_v46, %v2358_v47 }
  0x1b   :  { %2986 = vmatpush.bf16.msra.mxu3 %v2485_v7  ;;  %v2469_v11 = vor.u32 %v2892_v9, %v2468_v8  ;;  %v2324_v12 = vld [vmem:[#allocation5 + $0xa0] sm:$0xf]  ;;  %v2856_v13 = vld [vmem:[#allocation5 + $0xac] sm:$0xf0]  ;;  %642 = vmatpush.bf16.msra.mxu1 %v2485_v7  ;;  %v2486_v50 = vld [vmem:[#allocation5 + $0x1f0] sm:$0xf0] }
  0x1c   :  { %v2452_v14 = vld [vmem:[#allocation5 + $0x1a0] sm:$0xf]  ;;  %v2888_v15 = vld [vmem:[#allocation5 + $0x1ac] sm:$0xf0]  ;;  %v2325_v16 = vor.u32 %v2856_v13, %v2324_v12  ;;  %v2819_v52 = vld [vmem:[#allocation2 + $0x4] sm:$0xf0]  ;;  %v2489_v60 = vor.u32 %v2894_v49, %v2486_v50 }
  0x1d   :  { %v2453_v17 = vor.u32 %v2888_v15, %v2452_v14  ;;  %v2308_v18 = vld [vmem:[#allocation5 + $0x80] sm:$0xf]  ;;  %v2852_v19 = vld [vmem:[#allocation5 + $0x8c] sm:$0xf0]  ;;  %v2827_v54 = vld [vmem:[#allocation2 + $0x44] sm:$0xf0] }
  0x1e   :  { %594 = vmatpush.bf16.msra.mxu0 %v2341_v10  ;;  %2979 = vmatpush.bf16.msra.mxu2 %v2341_v10  ;;  %v2436_v20 = vld [vmem:[#allocation5 + $0x180] sm:$0xf]  ;;  %v2884_v21 = vld [vmem:[#allocation5 + $0x18c] sm:$0xf0]  ;;  %v2309_v22 = vor.u32 %v2852_v19, %v2308_v18  ;;  %v2826_v56 = vld [vmem:[#allocation2 + $0x44] sm:$0xf] }
  0x1f   :  { %2987 = vmatpush.bf16.msra.mxu3 %v2469_v11  ;;  %643 = vmatpush.bf16.msra.mxu1 %v2469_v11  ;;  %v2437_v23 = vor.u32 %v2884_v21, %v2436_v20  ;;  %v2292_v24 = vld [vmem:[#allocation5 + $0x60] sm:$0xf]  ;;  %v2848_v25 = vld [vmem:[#allocation5 + $0x6c] sm:$0xf0]  ;;  %v2214_v57 = vld [vmem:[#allocation2 + $0x48] sm:$0xf0] }
  0x20   :  { %v2420_v26 = vld [vmem:[#allocation5 + $0x160] sm:$0xf]  ;;  %v2880_v27 = vld [vmem:[#allocation5 + $0x16c] sm:$0xf0]  ;;  %v2293_v28 = vor.u32 %v2848_v25, %v2292_v24  ;;  %v2858_v59 = vld [vmem:[#allocation5 + $0xc4] sm:$0xf]  ;;  %v3236_v4 = vor.u32 %v2826_v56, %v2214_v57 }
  0x21   :  { %v2421_v29 = vor.u32 %v2880_v27, %v2420_v26  ;;  %v2276_v30 = vld [vmem:[#allocation5 + $0x40] sm:$0xf]  ;;  %v2844_v31 = vld [vmem:[#allocation5 + $0x4c] sm:$0xf0]  ;;  %v2342_v61 = vld [vmem:[#allocation5 + $0xd0] sm:$0xf0] }
  0x22   :  { %595 = vmatpush.bf16.msra.mxu0 %v2325_v16  ;;  %2980 = vmatpush.bf16.msra.mxu2 %v2325_v16  ;;  %v2404_v32 = vld [vmem:[#allocation5 + $0x140] sm:$0xf]  ;;  %v2876_v33 = vld [vmem:[#allocation5 + $0x14c] sm:$0xf0]  ;;  %v2277_v34 = vor.u32 %v2844_v31, %v2276_v30  ;;  %v2818_v62 = vld [vmem:[#allocation2 + $0x4] sm:$0xf]  ;;  %v2345_v5 = vor.u32 %v2858_v59, %v2342_v61 }
  0x23   :  { %2988 = vmatpush.bf16.msra.mxu3 %v2453_v17  ;;  %644 = vmatpush.bf16.msra.mxu1 %v2453_v17  ;;  %v2405_v35 = vor.u32 %v2876_v33, %v2404_v32  ;;  %v2260_v36 = vld [vmem:[#allocation5 + $0x20] sm:$0xf]  ;;  %v2840_v37 = vld [vmem:[#allocation5 + $0x2c] sm:$0xf0]  ;;  %v2182_v63 = vld [vmem:[#allocation2 + $0x8] sm:$0xf0] }
  0x24   :  { %v2388_v38 = vld [vmem:[#allocation5 + $0x120] sm:$0xf]  ;;  %v2872_v39 = vld [vmem:[#allocation5 + $0x12c] sm:$0xf0]  ;;  %v2261_v40 = vor.u32 %v2840_v37, %v2260_v36  ;;  %v2890_v2 = vld [vmem:[#allocation5 + $0x1c4] sm:$0xf]  ;;  %v3238_v7 = vor.u32 %v2818_v62, %v2182_v63 }
  0x25   :  { %v2389_v41 = vor.u32 %v2872_v39, %v2388_v38  ;;  %v2244_v42 = vld [vmem:[#allocation5] sm:$0xf]  ;;  %v2836_v43 = vld [vmem:[#allocation5 + $0xc] sm:$0xf0]  ;;  %v2470_v3 = vld [vmem:[#allocation5 + $0x1d0] sm:$0xf0] }
  0x26   :  { %596 = vmatpush.bf16.msra.mxu0 %v2309_v22  ;;  %2981 = vmatpush.bf16.msra.mxu2 %v2309_v22  ;;  %v2372_v44 = vld [vmem:[#allocation5 + $0x100] sm:$0xf]  ;;  %v2868_v45 = vld [vmem:[#allocation5 + $0x10c] sm:$0xf0]  ;;  %v2245_v51 = vor.u32 %v2836_v43, %v2244_v42  ;;  %v2854_v6 = vld [vmem:[#allocation5 + $0xa4] sm:$0xf]  ;;  %v2473_v8 = vor.u32 %v2890_v2, %v2470_v3 }
  0x27   :  { %2989 = vmatpush.bf16.msra.mxu3 %v2437_v23  ;;  %645 = vmatpush.bf16.msra.mxu1 %v2437_v23  ;;  %v2180_v48 = vld [vmem:[#allocation2] sm:$0xf]  ;;  %v2373_v55 = vor.u32 %v2868_v45, %v2372_v44  ;;  %v2326_v9 = vld [vmem:[#allocation5 + $0xb0] sm:$0xf0]  ;;  %v2364_v10 = vld [vmem:[#allocation5 + $0xe8] sm:$0xf] }
  0x28   :  { %v2212_v53 = vld [vmem:[#allocation2 + $0x40] sm:$0xf]  ;;  %v3232_v0 = vor.u32 %v2819_v52, %v2180_v48  ;;  %v2865_v11 = vld [vmem:[#allocation5 + $0xf4] sm:$0xf0]  ;;  %v2886_v12 = vld [vmem:[#allocation5 + $0x1a4] sm:$0xf]  ;;  %v2329_v15 = vor.u32 %v2854_v6, %v2326_v9 }
  0x29   :  { %v3234_v1 = vor.u32 %v2827_v54, %v2212_v53  ;;  %v2454_v13 = vld [vmem:[#allocation5 + $0x1b0] sm:$0xf0]  ;;  %v2365_v14 = vor.u32 %v2865_v11, %v2364_v10  ;;  %v2850_v16 = vld [vmem:[#allocation5 + $0x84] sm:$0xf]  ;;  %v2348_v20 = vld [vmem:[#allocation5 + $0xc8] sm:$0xf] }
  0x2a   :  { %597 = vmatpush.bf16.msra.mxu0 %v2293_v28  ;;  %2982 = vmatpush.bf16.msra.mxu2 %v2293_v28  ;;  %v2310_v17 = vld [vmem:[#allocation5 + $0x90] sm:$0xf0]  ;;  %v2457_v18 = vor.u32 %v2886_v12, %v2454_v13  ;;  %v2882_v19 = vld [vmem:[#allocation5 + $0x184] sm:$0xf]  ;;  %v2861_v21 = vld [vmem:[#allocation5 + $0xd4] sm:$0xf0] }
  0x2b   :  { %2990 = vmatpush.bf16.msra.mxu3 %v2421_v29  ;;  %646 = vmatpush.bf16.msra.mxu1 %v2421_v29  ;;  %v2438_v22 = vld [vmem:[#allocation5 + $0x190] sm:$0xf0]  ;;  %v2349_v23 = vor.u32 %v2861_v21, %v2348_v20  ;;  %v2332_v24 = vld [vmem:[#allocation5 + $0xa8] sm:$0xf]  ;;  %v2857_v25 = vld [vmem:[#allocation5 + $0xb4] sm:$0xf0]  ;;  %v2313_v26 = vor.u32 %v2850_v16, %v2310_v17 }
  0x2c   :  { %v2188_v27 = vld [vmem:[#allocation2 + $0x10] sm:$0xf]  ;;  %v2441_v28 = vor.u32 %v2882_v19, %v2438_v22  ;;  %v2846_v29 = vld [vmem:[#allocation5 + $0x64] sm:$0xf]  ;;  %v2294_v30 = vld [vmem:[#allocation5 + $0x70] sm:$0xf0]  ;;  %v2333_v32 = vor.u32 %v2857_v25, %v2332_v24 }
  0x2d   :  { %v2878_v31 = vld [vmem:[#allocation5 + $0x164] sm:$0xf]  ;;  %v2422_v33 = vld [vmem:[#allocation5 + $0x170] sm:$0xf0]  ;;  %v2821_v36 = vld [vmem:[#allocation2 + $0x14] sm:$0xf0] }
  0x2e   :  { %598 = vmatpush.bf16.msra.mxu0 %v2277_v34  ;;  %2983 = vmatpush.bf16.msra.mxu2 %v2277_v34  ;;  %v2316_v34 = vld [vmem:[#allocation5 + $0x88] sm:$0xf]  ;;  %v2220_v37 = vld [vmem:[#allocation2 + $0x50] sm:$0xf]  ;;  %v2829_v38 = vld [vmem:[#allocation2 + $0x54] sm:$0xf0]  ;;  %v2425_v43 = vor.u32 %v2878_v31, %v2422_v33  ;;  %v3244_v48 = vor.u32 %v2821_v36, %v2188_v27 }
  0x2f   :  { %2991 = vmatpush.bf16.msra.mxu3 %v2405_v35  ;;  %647 = vmatpush.bf16.msra.mxu1 %v2405_v35  ;;  %v2853_v35 = vld [vmem:[#allocation5 + $0x94] sm:$0xf0]  ;;  %v2828_v39 = vld [vmem:[#allocation2 + $0x54] sm:$0xf]  ;;  %v2190_v44 = vld [vmem:[#allocation2 + $0x18] sm:$0xf0]  ;;  %v3246_v49 = vor.u32 %v2829_v38, %v2220_v37 }
  0x30   :  { %v2820_v42 = vld [vmem:[#allocation2 + $0x14] sm:$0xf]  ;;  %v2842_v45 = vld [vmem:[#allocation5 + $0x44] sm:$0xf]  ;;  %v2317_v47 = vor.u32 %v2853_v35, %v2316_v34  ;;  %v2300_v56 = vld [vmem:[#allocation5 + $0x68] sm:$0xf] }
  0x31   :  { %v2278_v46 = vld [vmem:[#allocation5 + $0x50] sm:$0xf0]  ;;  %v2874_v50 = vld [vmem:[#allocation5 + $0x144] sm:$0xf]  ;;  %v3250_v53 = vor.u32 %v2820_v42, %v2190_v44  ;;  %v2849_v57 = vld [vmem:[#allocation5 + $0x74] sm:$0xf0] }
  0x32   :  { %599 = vmatpush.bf16.msra.mxu0 %v2261_v40  ;;  %2984 = vmatpush.bf16.msra.mxu2 %v2261_v40  ;;  %v2222_v40 = vld [vmem:[#allocation2 + $0x58] sm:$0xf0]  ;;  %v2281_v54 = vor.u32 %v2842_v45, %v2278_v46  ;;  %v2838_v59 = vld [vmem:[#allocation5 + $0x24] sm:$0xf]  ;;  %v2390_v63 = vld [vmem:[#allocation5 + $0x130] sm:$0xf0] }
  0x33   :  { %2992 = vmatpush.bf16.msra.mxu3 %v2389_v41  ;;  %648 = vmatpush.bf16.msra.mxu1 %v2389_v41  ;;  %v2297_v41 = vor.u32 %v2846_v29, %v2294_v30  ;;  %v3248_v52 = vor.u32 %v2828_v39, %v2222_v40  ;;  %v2870_v61 = vld [vmem:[#allocation5 + $0x124] sm:$0xf]  ;;  %v2284_v3 = vld [vmem:[#allocation5 + $0x48] sm:$0xf]  ;;  %v2897_v9 = vld [vmem:[#allocation5 + $0x1f4] sm:$0xf0] }
  0x34   :  { %v2393_v2 = vor.u32 %v2870_v61, %v2390_v63  ;;  %v2492_v6 = vld [vmem:[#allocation5 + $0x1e8] sm:$0xf]  ;;  %v2834_v10 = vld [vmem:[#allocation5 + $0x4] sm:$0xf]  ;;  %v2246_v11 = vld [vmem:[#allocation5 + $0x10] sm:$0xf0] }
  0x35   :  { %v2493_v12 = vor.u32 %v2897_v9, %v2492_v6  ;;  %v2268_v13 = vld [vmem:[#allocation5 + $0x28] sm:$0xf]  ;;  %v2249_v16 = vor.u32 %v2834_v10, %v2246_v11  ;;  %v2893_v17 = vld [vmem:[#allocation5 + $0x1d4] sm:$0xf0]  ;;  %v2374_v19 = vld [vmem:[#allocation5 + $0x110] sm:$0xf0] }
  0x36   :  { %600 = vmatpush.bf16.msra.mxu0 %v2245_v51  ;;  %2985 = vmatpush.bf16.msra.mxu2 %v2245_v51  ;;  %v2406_v51 = vld [vmem:[#allocation5 + $0x150] sm:$0xf0]  ;;  %v2196_v20 = vld [vmem:[#allocation2 + $0x20] sm:$0xf]  ;;  %v2252_v25 = vld [vmem:[#allocation5 + $0x8] sm:$0xf] }
  0x37   :  { %2993 = vmatpush.bf16.msra.mxu3 %v2373_v55  ;;  %649 = vmatpush.bf16.msra.mxu1 %v2373_v55  ;;  %v2409_v55 = vor.u32 %v2874_v50, %v2406_v51  ;;  %v2228_v27 = vld [vmem:[#allocation2 + $0x60] sm:$0xf]  ;;  %v2830_v29 = vld [vmem:[#allocation2 + $0x64] sm:$0xf]  ;;  %v2230_v30 = vld [vmem:[#allocation2 + $0x68] sm:$0xf0] }
  0x38   :  { %v2460_v31 = vld [vmem:[#allocation5 + $0x1a8] sm:$0xf]  ;;  %v2822_v33 = vld [vmem:[#allocation2 + $0x24] sm:$0xf]  ;;  %v2198_v34 = vld [vmem:[#allocation2 + $0x28] sm:$0xf0]  ;;  %v3260_v38 = vor.u32 %v2830_v29, %v2230_v30 }
  0x39   :  { %601 = vmatmul.bf16.vlgmr.msra.gmra.mxu0 %v3232_v0  ;;  %621 = vmatmul.bf16.vlgmr.msra.gmra.mxu2 %v3234_v1  ;;  %v3262_v40 = vor.u32 %v2822_v33, %v2198_v34  ;;  %v2885_v42 = vld [vmem:[#allocation5 + $0x194] sm:$0xf0]  ;;  %v2366_v44 = vld [vmem:[#allocation5 + $0xf8] sm:$0xf0]  ;;  %v2895_v46 = vld [vmem:[#allocation5 + $0x1ec] sm:$0xf] }
  0x3a   :  { %691 = vmatpush.bf16.msrb.mxu2 %v2361_v58  ;;  %670 = vmatmul.bf16.vlgmr.msra.gmra.mxu3 %v3236_v4  ;;  %v2301_v58 = vor.u32 %v2849_v57, %v2300_v56  ;;  %v2494_v50 = vld [vmem:[#allocation5 + $0x1f8] sm:$0xf0]  ;;  %v2412_v57 = vld [vmem:[#allocation5 + $0x148] sm:$0xf]  ;;  %v2236_v61 = vld [vmem:[#allocation2 + $0x70] sm:$0xf] }
  0x3b   :  { %740 = vmatpush.bf16.msrb.mxu3 %v2489_v60  ;;  %650 = vmatmul.bf16.vlgmr.msra.gmra.mxu1 %v3238_v7  ;;  %v2262_v60 = vld [vmem:[#allocation5 + $0x30] sm:$0xf0]  ;;  %v2497_v51 = vor.u32 %v2895_v46, %v2494_v50  ;;  %v2873_v6 = vld [vmem:[#allocation5 + $0x134] sm:$0xf0]  ;;  %v2206_v9 = vld [vmem:[#allocation2 + $0x38] sm:$0xf0] }
  0x3c   :  { %789 = vmatpush.bf16.msrb.mxu0 %v2365_v14  ;;  %v2265_v62 = vor.u32 %v2838_v59, %v2262_v60  ;;  %v2841_v14 = vld [vmem:[#allocation5 + $0x34] sm:$0xf0]  ;;  %838 = vmatpush.bf16.msrb.mxu1 %v2493_v12  ;;  %v2204_v59 = vld [vmem:[#allocation2 + $0x30] sm:$0xf]  ;;  %v2832_v63 = vld [vmem:[#allocation2 + $0x74] sm:$0xf] }
  0x3d   :  { %v2269_v21 = vor.u32 %v2841_v14, %v2268_v13  ;;  %v2825_v60 = vld [vmem:[#allocation2 + $0x34] sm:$0xf0]  ;;  %v2851_v30 = vld [vmem:[#allocation5 + $0x8c] sm:$0xf]  ;;  %v2446_v34 = vld [vmem:[#allocation5 + $0x198] sm:$0xf0] }
  0x3e   :  { %692 = vmatpush.bf16.msrb.mxu2 %v2345_v5  ;;  %v2845_v5 = vld [vmem:[#allocation5 + $0x54] sm:$0xf0]  ;;  %v3268_v10 = vor.u32 %v2825_v60, %v2204_v59  ;;  %v2843_v46 = vld [vmem:[#allocation5 + $0x4c] sm:$0xf]  ;;  %v2556_v59 = vld [vmem:[#allocation8 + $0x70] sm:$0xf] }
  0x3f   :  { %741 = vmatpush.bf16.msrb.mxu3 %v2473_v8  ;;  %v2285_v8 = vor.u32 %v2845_v5, %v2284_v3  ;;  %v2238_v3 = vld [vmem:[#allocation2 + $0x78] sm:$0xf0]  ;;  %v2396_v5 = vld [vmem:[#allocation5 + $0x128] sm:$0xf]  ;;  %v2875_v50 = vld [vmem:[#allocation5 + $0x14c] sm:$0xf] }
  0x40   :  { %790 = vmatpush.bf16.msrb.mxu0 %v2349_v23  ;;  %v2823_v23 = vld [vmem:[#allocation2 + $0x24] sm:$0xf0]  ;;  %v3272_v12 = vor.u32 %v2832_v63, %v2238_v3  ;;  %v2397_v13 = vor.u32 %v2873_v6, %v2396_v5  ;;  %v2913_v60 = vld [vmem:[#allocation8 + $0x74] sm:$0xf0]  ;;  %v2839_v63 = vld [vmem:[#allocation5 + $0x2c] sm:$0xf] }
  0x41   :  { %v3256_v36 = vor.u32 %v2823_v23, %v2196_v20  ;;  %v2891_v20 = vld [vmem:[#allocation5 + $0x1cc] sm:$0xf]  ;;  %v2398_v6 = vld [vmem:[#allocation5 + $0x138] sm:$0xf0]  ;;  %s2163_s10 = sshll.u32 %s3833_s7, 4  ;;  %s2164_s10 = int_to_ptr.hbm [resolvable:$true] %s2163_s10 }
  0x42   :  { %693 = vmatpush.bf16.msrb.mxu2 %v2329_v15  ;;  %v2476_v15 = vld [vmem:[#allocation5 + $0x1c8] sm:$0xf]  ;;  %v2871_v3 = vld [vmem:[#allocation5 + $0x12c] sm:$0xf] }
  0x43   :  { %742 = vmatpush.bf16.msrb.mxu3 %v2457_v18  ;;  %v2866_v18 = vld [vmem:[#allocation5 + $0x104] sm:$0xf]  ;;  %v2477_v24 = vor.u32 %v2893_v17, %v2476_v15  ;;  %v2380_v15 = vld [vmem:[#allocation5 + $0x108] sm:$0xf]  ;;  %v2859_v17 = vld [vmem:[#allocation5 + $0xcc] sm:$0xf] }
  0x44   :  { %791 = vmatpush.bf16.msrb.mxu0 %v2333_v32  ;;  %v2377_v22 = vor.u32 %v2866_v18, %v2374_v19  ;;  %v2889_v32 = vld [vmem:[#allocation5 + $0x1b4] sm:$0xf0]  ;;  %v2350_v18 = vld [vmem:[#allocation5 + $0xd8] sm:$0xf0] }
  0x45   :  { %839 = vmatpush.bf16.msrb.mxu1 %v2477_v24  ;;  %v2461_v39 = vor.u32 %v2889_v32, %v2460_v31  ;;  %v2855_v24 = vld [vmem:[#allocation5 + $0xac] sm:$0xf]  ;;  %v2318_v31 = vld [vmem:[#allocation5 + $0x98] sm:$0xf0] }
  0x46   :  { %694 = vmatpush.bf16.msrb.mxu2 %v2313_v26  ;;  %v2837_v26 = vld [vmem:[#allocation5 + $0x14] sm:$0xf0]  ;;  %v2883_v32 = vld [vmem:[#allocation5 + $0x18c] sm:$0xf]  ;;  %v2321_v33 = vor.u32 %v2851_v30, %v2318_v31 }
  0x47   :  { %743 = vmatpush.bf16.msrb.mxu3 %v2441_v28  ;;  %v2831_v28 = vld [vmem:[#allocation2 + $0x64] sm:$0xf0]  ;;  %v2253_v35 = vor.u32 %v2837_v26, %v2252_v25  ;;  %v2334_v25 = vld [vmem:[#allocation5 + $0xb8] sm:$0xf0]  ;;  %v2887_v26 = vld [vmem:[#allocation5 + $0x1ac] sm:$0xf] }
  0x48   :  { %792 = vmatpush.bf16.msrb.mxu0 %v2317_v47  ;;  %v3258_v37 = vor.u32 %v2831_v28, %v2228_v27  ;;  %v2337_v27 = vor.u32 %v2855_v24, %v2334_v25  ;;  %v2462_v28 = vld [vmem:[#allocation5 + $0x1b8] sm:$0xf0] }
  0x49   :  { %606 = vmatmul.bf16.gmra.mxu0 %v3244_v48  ;;  %626 = vmatmul.bf16.gmra.mxu2 %v3246_v49  ;;  %v2465_v29 = vor.u32 %v2887_v26, %v2462_v28  ;;  %v2532_v26 = vld [vmem:[#allocation8 + $0x40] sm:$0xf] }
  0x4a   :  { %695 = vmatpush.bf16.msrb.mxu2 %v2297_v41  ;;  %675 = vmatmul.bf16.gmra.mxu3 %v3248_v52  ;;  %v2444_v41 = vld [vmem:[#allocation5 + $0x188] sm:$0xf] }
  0x4b   :  { %744 = vmatpush.bf16.msrb.mxu3 %v2425_v43  ;;  %655 = vmatmul.bf16.gmra.mxu1 %v3250_v53  ;;  %v2863_v43 = vld [vmem:[#allocation5 + $0xec] sm:$0xf]  ;;  %v2445_v45 = vor.u32 %v2885_v42, %v2444_v41  ;;  %v2302_v41 = vld [vmem:[#allocation5 + $0x78] sm:$0xf0] }
  0x4c   :  { %793 = vmatpush.bf16.msrb.mxu0 %v2301_v58  ;;  %840 = vmatpush.bf16.msrb.mxu1 %v2461_v39  ;;  %v2369_v47 = vor.u32 %v2863_v43, %v2366_v44  ;;  %v2877_v58 = vld [vmem:[#allocation5 + $0x154] sm:$0xf0]  ;;  %v2847_v39 = vld [vmem:[#allocation5 + $0x6c] sm:$0xf]  ;;  %v2430_v44 = vld [vmem:[#allocation5 + $0x178] sm:$0xf0] }
  0x4d   :  { %v2879_v42 = vld [vmem:[#allocation5 + $0x16c] sm:$0xf]  ;;  %v2305_v43 = vor.u32 %v2847_v39, %v2302_v41 }
  0x4e   :  { %696 = vmatpush.bf16.msrb.mxu2 %v2281_v54  ;;  %v2428_v54 = vld [vmem:[#allocation5 + $0x168] sm:$0xf] }
  0x4f   :  { %745 = vmatpush.bf16.msrb.mxu3 %v2409_v55  ;;  %v2881_v55 = vld [vmem:[#allocation5 + $0x174] sm:$0xf0] }
  0x50   :  { %794 = vmatpush.bf16.msrb.mxu0 %v2285_v8  ;;  %841 = vmatpush.bf16.msrb.mxu1 %v2445_v45  ;;  %v2429_v56 = vor.u32 %v2881_v55, %v2428_v54  ;;  %v2824_v8 = vld [vmem:[#allocation2 + $0x34] sm:$0xf]  ;;  %v2433_v45 = vor.u32 %v2879_v42, %v2430_v44  ;;  %v2414_v54 = vld [vmem:[#allocation5 + $0x158] sm:$0xf0] }
  0x51   :  { %v3274_v14 = vor.u32 %v2824_v8, %v2206_v9  ;;  %v2417_v55 = vor.u32 %v2875_v50, %v2414_v54  ;;  %v2401_v9 = vor.u32 %v2871_v3, %v2398_v6  ;;  %v2254_v44 = vld [vmem:[#allocation5 + $0x18] sm:$0xf0] }
  0x52   :  { %697 = vmatpush.bf16.msrb.mxu2 %v2265_v62  ;;  %v2833_v62 = vld [vmem:[#allocation2 + $0x74] sm:$0xf0]  ;;  %v2929_v3 = vld [vmem:[#allocation8 + $0xf4] sm:$0xf0] }
  0x53   :  { %746 = vmatpush.bf16.msrb.mxu3 %v2393_v2  ;;  %v2413_v2 = vor.u32 %v2877_v58, %v2412_v57  ;;  %v3270_v11 = vor.u32 %v2833_v62, %v2236_v61  ;;  %v2557_v62 = vor.u32 %v2913_v60, %v2556_v59  ;;  %v2903_v59 = vld [vmem:[#allocation8 + $0x24] sm:$0xf0]  ;;  %v2620_v60 = vld [vmem:[#allocation8 + $0xf0] sm:$0xf] }
  0x54   :  { %795 = vmatpush.bf16.msrb.mxu0 %v2269_v21  ;;  %842 = vmatpush.bf16.msrb.mxu1 %v2429_v56  ;;  %v2353_v21 = vor.u32 %v2859_v17, %v2350_v18  ;;  %v3296_v56 = vld [vmem:[#allocation7] sm:$0xf]  ;;  %v2621_v6 = vor.u32 %v2929_v3, %v2620_v60  ;;  %v2919_v3 = vld [vmem:[#allocation8 + $0xa4] sm:$0xf0] }
  0x55   :  { %v3303_v61 = vperm.slane %v3296_v56, 0 }
  0x56   :  { %698 = vmatpush.bf16.msrb.mxu2 %v2249_v16  ;;  %v2869_v16 = vld [vmem:[#allocation5 + $0x114] sm:$0xf0] }
  0x57   :  { %747 = vmatpush.bf16.msrb.mxu3 %v2377_v22  ;;  %v2381_v19 = vor.u32 %v2869_v16, %v2380_v15  ;;  %v2478_v22 = vld [vmem:[#allocation5 + $0x1d8] sm:$0xf0]  ;;  %v2911_v15 = vld [vmem:[#allocation8 + $0x64] sm:$0xf0] }
  0x58   :  { %796 = vmatpush.bf16.msrb.mxu0 %v2253_v35  ;;  %843 = vmatpush.bf16.msrb.mxu1 %v2413_v2  ;;  %v2481_v23 = vor.u32 %v2891_v20, %v2478_v22  ;;  %v2449_v35 = vor.u32 %v2883_v32, %v2446_v34  ;;  %v2270_v2 = vld [vmem:[#allocation5 + $0x38] sm:$0xf0]  ;;  %v2540_v22 = vld [vmem:[#allocation8 + $0x50] sm:$0xf] }
  0x59   :  { %611 = vmatmul.bf16.gmra.mxu0 %v3256_v36  ;;  %631 = vmatmul.bf16.gmra.mxu2 %v3258_v37  ;;  %v2273_v5 = vor.u32 %v2839_v63, %v2270_v2  ;;  %v2524_v34 = vld [vmem:[#allocation8 + $0x30] sm:$0xf] }
  0x5a   :  { %680 = vmatmul.bf16.gmra.mxu3 %v3260_v38  ;;  %887 = vmatpush.bf16.msra.mxu2 %v2369_v47  ;;  %v2286_v47 = vld [vmem:[#allocation5 + $0x58] sm:$0xf0] }
  0x5b   :  { %660 = vmatmul.bf16.gmra.mxu1 %v3262_v40  ;;  %936 = vmatpush.bf16.msra.mxu3 %v2497_v51  ;;  %v2289_v51 = vor.u32 %v2843_v46, %v2286_v47  ;;  %v2382_v47 = vld [vmem:[#allocation5 + $0x118] sm:$0xf0] }
  0x5c   :  { %844 = vmatpush.bf16.msrb.mxu1 %v2397_v13  ;;  %1471 = vmatpush.bf16.msra.mxu0 %v2557_v62  ;;  %v2548_v13 = vld [vmem:[#allocation8 + $0x60] sm:$0xf] }
  0x5d   :  { %v2549_v18 = vor.u32 %v2911_v15, %v2548_v13  ;;  %v2508_v13 = vld [vmem:[#allocation8 + $0x10] sm:$0xf]  ;;  %v2901_v15 = vld [vmem:[#allocation8 + $0x14] sm:$0xf0] }
  0x5e   :  { %888 = vmatpush.bf16.msra.mxu2 %v2353_v21 }
  0x5f   :  { %937 = vmatpush.bf16.msra.mxu3 %v2481_v23  ;;  %v2909_v23 = vld [vmem:[#allocation8 + $0x54] sm:$0xf0] }
  0x60   :  { %845 = vmatpush.bf16.msrb.mxu1 %v2381_v19  ;;  %1472 = vmatpush.bf16.msra.mxu0 %v2549_v18  ;;  %v2541_v24 = vor.u32 %v2909_v23, %v2540_v22  ;;  %v2927_v18 = vld [vmem:[#allocation8 + $0xe4] sm:$0xf0]  ;;  %v2500_v23 = vld [vmem:[#allocation8] sm:$0xf] }
  0x62   :  { %889 = vmatpush.bf16.msra.mxu2 %v2337_v27  ;;  %v2907_v27 = vld [vmem:[#allocation8 + $0x44] sm:$0xf0] }
  0x63   :  { %938 = vmatpush.bf16.msra.mxu3 %v2465_v29  ;;  %v2533_v30 = vor.u32 %v2907_v27, %v2532_v26 }
  0x64   :  { %1473 = vmatpush.bf16.msra.mxu0 %v2541_v24  ;;  %1520 = vmatpush.bf16.msra.mxu1 %v2621_v6  ;;  %v2899_v24 = vld [vmem:[#allocation8 + $0x4] sm:$0xf0] }
  0x66   :  { %890 = vmatpush.bf16.msra.mxu2 %v2321_v33 }
  0x67   :  { %939 = vmatpush.bf16.msra.mxu3 %v2449_v35  ;;  %v2905_v35 = vld [vmem:[#allocation8 + $0x34] sm:$0xf0] }
  0x68   :  { %1474 = vmatpush.bf16.msra.mxu0 %v2533_v30  ;;  %v2525_v42 = vor.u32 %v2905_v35, %v2524_v34 }
  0x69   :  { %616 = vmatmul.bf16.gmra.mxu0 %v3268_v10  ;;  %636 = vmatmul.bf16.gmra.mxu2 %v3270_v11 }
  0x6a   :  { %685 = vmatmul.bf16.gmra.mxu3 %v3272_v12  ;;  %891 = vmatpush.bf16.msra.mxu2 %v2305_v43  ;;  %v2835_v43 = vld [vmem:[#allocation5 + $0xc] sm:$0xf] }
  0x6b   :  { %665 = vmatmul.bf16.gmra.mxu1 %v3274_v14  ;;  %940 = vmatpush.bf16.msra.mxu3 %v2433_v45  ;;  %v2867_v45 = vld [vmem:[#allocation5 + $0x10c] sm:$0xf]  ;;  %v2257_v46 = vor.u32 %v2835_v43, %v2254_v44 }
  0x6c   :  { %1475 = vmatpush.bf16.msra.mxu0 %v2525_v42  ;;  %v2385_v54 = vor.u32 %v2867_v45, %v2382_v47  ;;  %v2588_v47 = vld [vmem:[#allocation8 + $0xb0] sm:$0xf] }
  0x6e   :  { %892 = vmatpush.bf16.msra.mxu2 %v2289_v51 }
  0x6f   :  { %941 = vmatpush.bf16.msra.mxu3 %v2417_v55  ;;  %v2516_v55 = vld [vmem:[#allocation8 + $0x20] sm:$0xf] }
  0x70   :  { %v2517_v2 = vor.u32 %v2903_v59, %v2516_v55 }
  0x72   :  { %893 = vmatpush.bf16.msra.mxu2 %v2273_v5  ;;  %1476 = vmatpush.bf16.msra.mxu0 %v2517_v2  ;;  %v2580_v2 = vld [vmem:[#allocation8 + $0xa0] sm:$0xf] }
  0x73   :  { %942 = vmatpush.bf16.msra.mxu3 %v2401_v9  ;;  %v2581_v6 = vor.u32 %v2919_v3, %v2580_v2  ;;  %v2961_v2 = vld [vmem:[#allocation8 + $0x1f4] sm:$0xf0] }
  0x76   :  { %894 = vmatpush.bf16.msra.mxu2 %v2257_v46 }
  0x77   :  { %943 = vmatpush.bf16.msra.mxu3 %v2385_v54 }
  0x79   :  { %699 = vmatmul.bf16.vlgmr.msrb.gmra.mxu2 %v3232_v0  ;;  %797 = vmatmul.bf16.vlgmr.msrb.gmra.mxu0 %v3232_v0 }
  0x7a   :  { %748 = vmatmul.bf16.vlgmr.msrb.gmra.mxu3 %v3238_v7 }
  0x7b   :  { %846 = vmatmul.bf16.vlgmr.msrb.gmra.mxu1 %v3238_v7 }
  0x89   :  { %704 = vmatmul.bf16.gmra.mxu2 %v3244_v48  ;;  %802 = vmatmul.bf16.gmra.mxu0 %v3244_v48 }
  0x8a   :  { %753 = vmatmul.bf16.gmra.mxu3 %v3250_v53 }
  0x8b   :  { %851 = vmatmul.bf16.gmra.mxu1 %v3250_v53 }
  0x99   :  { %709 = vmatmul.bf16.gmra.mxu2 %v3256_v36  ;;  %807 = vmatmul.bf16.gmra.mxu0 %v3256_v36 }
  0x9a   :  { %758 = vmatmul.bf16.gmra.mxu3 %v3262_v40 }
  0x9b   :  { %856 = vmatmul.bf16.gmra.mxu1 %v3262_v40 }
  0xa9   :  { %714 = vmatmul.bf16.gmra.mxu2 %v3268_v10  ;;  %812 = vmatmul.bf16.gmra.mxu0 %v3268_v10 }
  0xaa   :  { %763 = vmatmul.bf16.gmra.mxu3 %v3274_v14 }
  0xab   :  { %861 = vmatmul.bf16.gmra.mxu1 %v3274_v14 }
  0xb6   :  { %v3298_v57 = vpop.f32.mrf.mxu0 }
  0xb8   :  { %v3300_v58 = vpop.f32.mrf.mxu1 }
  0xb9   :  { %719 = vmatmul.bf16.gmra.mxu2 %v3234_v1  ;;  %817 = vmatmul.bf16.gmra.mxu0 %v3234_v1 }
  0xba   :  { %768 = vmatmul.bf16.gmra.mxu3 %v3236_v4 }
  0xbb   :  { %866 = vmatmul.bf16.gmra.mxu1 %v3236_v4 }
  0xbc   :  { %v622_v8 = vpop.f32.mrf.mxu2 }
  0xbd   :  { %v623_v16 = vadd.f32 %v622_v8, %v3303_v61  ;;  %v671_v17 = vpop.f32.mrf.mxu3 }
  0xbe   :  { %v3310_v19 = vpop.f32.mrf.mxu0 }
  0xbf   :  { %v672_v20 = vadd.f32 %v671_v17, %v623_v16  ;;  %v2612_v16 = vld [vmem:[#allocation8 + $0xe0] sm:$0xf]  ;;  %v2509_v17 = vor.u32 %v2901_v15, %v2508_v13  ;;  %v2572_v13 = vld [vmem:[#allocation8 + $0x90] sm:$0xf]  ;;  %v2917_v15 = vld [vmem:[#allocation8 + $0x94] sm:$0xf0] }
  0xc0   :  { %v3312_v21 = vpop.f32.mrf.mxu1 }
  0xc1   :  { %v1017_v39 = vmax.f32 %v672_v20, 0.0  ;;  %v2613_v20 = vor.u32 %v2927_v18, %v2612_v16  ;;  %1477 = vmatpush.bf16.msra.mxu0 %v2509_v17  ;;  %v2573_v18 = vor.u32 %v2917_v15, %v2572_v13 }
  0xc3   :  { %1521 = vmatpush.bf16.msra.mxu1 %v2613_v20 }
  0xc4   :  { %v624_v25 = vpop.f32.mrf.mxu2 }
  0xc5   :  { %v625_v28 = vadd.f32 %v624_v25, %v3303_v61  ;;  %v673_v29 = vpop.f32.mrf.mxu3  ;;  %v2604_v25 = vld [vmem:[#allocation8 + $0xd0] sm:$0xf] }
  0xc6   :  { %v3315_v31 = vpop.f32.mrf.mxu0 }
  0xc7   :  { %v674_v32 = vadd.f32 %v673_v29, %v625_v28  ;;  %v2501_v28 = vor.u32 %v2899_v24, %v2500_v23  ;;  %v2925_v29 = vld [vmem:[#allocation8 + $0xd4] sm:$0xf0]  ;;  %v603_v23 = vadd.f32 %v3298_v57, %v3303_v61  ;;  %v2684_v57 = vld [vmem:[#allocation8 + $0x170] sm:$0xf] }
  0xc8   :  { %v3317_v33 = vpop.f32.mrf.mxu1 }
  0xc9   :  { %v1021_v41 = vmax.f32 %v674_v32, 0.0  ;;  %724 = vmatmul.bf16.gmra.mxu2 %v3246_v49  ;;  %822 = vmatmul.bf16.gmra.mxu0 %v3246_v49  ;;  %v2605_v32 = vor.u32 %v2925_v29, %v2604_v25  ;;  %v2564_v25 = vld [vmem:[#allocation8 + $0x80] sm:$0xf] }
  0xca   :  { %773 = vmatmul.bf16.gmra.mxu3 %v3248_v52  ;;  %1478 = vmatpush.bf16.msra.mxu0 %v2501_v28 }
  0xcb   :  { %871 = vmatmul.bf16.gmra.mxu1 %v3248_v52  ;;  %v3323_v50 = vpack.c.bf16 %v1021_v41, %v1017_v39  ;;  %v2596_v39 = vld [vmem:[#allocation8 + $0xc0] sm:$0xf]  ;;  %v2923_v41 = vld [vmem:[#allocation8 + $0xc4] sm:$0xf0] }
  0xcc   :  { %v627_v51 = vpop.f32.mrf.mxu2  ;;  %1522 = vmatpush.bf16.msra.mxu1 %v2605_v32  ;;  %v2597_v44 = vor.u32 %v2923_v41, %v2596_v39 }
  0xcd   :  { %v628_v62 = vadd.f32 %v627_v51, %v3303_v61  ;;  %v676_v63 = vpop.f32.mrf.mxu3  ;;  %v2921_v51 = vld [vmem:[#allocation8 + $0xb4] sm:$0xf0] }
  0xce   :  { %v3326_v5 = vpop.f32.mrf.mxu0  ;;  %v2589_v59 = vor.u32 %v2921_v51, %v2588_v47 }
  0xcf   :  { %v677_v8 = vadd.f32 %v676_v63, %v628_v62 }
  0xd0   :  { %v3328_v9 = vpop.f32.mrf.mxu1  ;;  %1523 = vmatpush.bf16.msra.mxu1 %v2597_v44 }
  0xd1   :  { %v1025_v42 = vmax.f32 %v677_v8, 0.0 }
  0xd4   :  { %v629_v22 = vpop.f32.mrf.mxu2  ;;  %1524 = vmatpush.bf16.msra.mxu1 %v2589_v59 }
  0xd5   :  { %v630_v26 = vadd.f32 %v629_v22, %v3303_v61  ;;  %v678_v27 = vpop.f32.mrf.mxu3 }
  0xd6   :  { %v3331_v30 = vpop.f32.mrf.mxu0 }
  0xd7   :  { %v679_v34 = vadd.f32 %v678_v27, %v630_v26  ;;  %v2915_v26 = vld [vmem:[#allocation8 + $0x84] sm:$0xf0]  ;;  %v605_v27 = vadd.f32 %v3310_v19, %v3303_v61  ;;  %v652_v19 = vadd.f32 %v3300_v58, %v603_v23 }
  0xd8   :  { %v3333_v35 = vpop.f32.mrf.mxu1  ;;  %1525 = vmatpush.bf16.msra.mxu1 %v2581_v6  ;;  %v2565_v32 = vor.u32 %v2915_v26, %v2564_v25  ;;  %v2676_v25 = vld [vmem:[#allocation8 + $0x160] sm:$0xf]  ;;  %v2943_v26 = vld [vmem:[#allocation8 + $0x164] sm:$0xf0] }
  0xd9   :  { %v1029_v43 = vmax.f32 %v679_v34, 0.0  ;;  %729 = vmatmul.bf16.gmra.mxu2 %v3258_v37  ;;  %827 = vmatmul.bf16.gmra.mxu0 %v3258_v37  ;;  %v2945_v34 = vld [vmem:[#allocation8 + $0x174] sm:$0xf0] }
  0xda   :  { %778 = vmatmul.bf16.gmra.mxu3 %v3260_v38 }
  0xdb   :  { %876 = vmatmul.bf16.gmra.mxu1 %v3260_v38  ;;  %v3339_v45 = vpack.c.bf16 %v1029_v43, %v1025_v42  ;;  %v2685_v42 = vor.u32 %v2945_v34, %v2684_v57  ;;  %v654_v43 = vadd.f32 %v3312_v21, %v605_v27  ;;  %v2677_v27 = vor.u32 %v2943_v26, %v2676_v25 }
  0xdc   :  { %v632_v46 = vpop.f32.mrf.mxu2  ;;  %1526 = vmatpush.bf16.msra.mxu1 %v2573_v18  ;;  %v610_v18 = vadd.f32 %v3326_v5, %v3303_v61  ;;  %v3387_v5 = vperm.slane %v3296_v56, 1 }
  0xdd   :  { %v633_v54 = vadd.f32 %v632_v46, %v3303_v61  ;;  %v681_v55 = vpop.f32.mrf.mxu3  ;;  %1569 = vmatpush.bf16.msrb.mxu2 %v2685_v42  ;;  %v989_v59 = vmax.f32 %v654_v43, 0.0  ;;  %v2959_v43 = vld [vmem:[#allocation8 + $0x1e4] sm:$0xf0] }
  0xde   :  { %v3342_v60 = vpop.f32.mrf.mxu0 }
  0xdf   :  { %v682_v62 = vadd.f32 %v681_v55, %v633_v54  ;;  %v985_v55 = vmax.f32 %v652_v19, 0.0  ;;  %v2740_v19 = vld [vmem:[#allocation8 + $0x1e0] sm:$0xf] }
  0xe0   :  { %v3344_v63 = vpop.f32.mrf.mxu1  ;;  %1527 = vmatpush.bf16.msra.mxu1 %v2565_v32 }
  0xe1   :  { %v1033_v28 = vmax.f32 %v682_v62, 0.0  ;;  %v2748_v62 = vld [vmem:[#allocation8 + $0x1f0] sm:$0xf]  ;;  %1570 = vmatpush.bf16.msrb.mxu2 %v2677_v27 }
  0xe2   :  { %v2749_v3 = vor.u32 %v2961_v2, %v2748_v62 }
  0xe4   :  { %v634_v8 = vpop.f32.mrf.mxu2  ;;  %1618 = vmatpush.bf16.msrb.mxu3 %v2749_v3  ;;  %v613_v3 = vadd.f32 %v3331_v30, %v3303_v61 }
  0xe5   :  { %v635_v16 = vadd.f32 %v634_v8, %v3303_v61  ;;  %v683_v17 = vpop.f32.mrf.mxu3  ;;  %v3368_v8 = vpack.c.bf16 %v989_v59, %v985_v55 }
  0xe6   :  { %v3347_v20 = vpop.f32.mrf.mxu0  ;;  %v662_v25 = vadd.f32 %v3333_v35, %v613_v3  ;;  %v2939_v3 = vld [vmem:[#allocation8 + $0x144] sm:$0xf0] }
  0xe7   :  { %v684_v22 = vadd.f32 %v683_v17, %v635_v16  ;;  %v608_v17 = vadd.f32 %v3315_v31, %v3303_v61  ;;  %v659_v31 = vadd.f32 %v3328_v9, %v610_v18 }
  0xe8   :  { %v3351_v24 = vpop.f32.mrf.mxu1  ;;  %v1001_v27 = vmax.f32 %v662_v25, 0.0  ;;  %v2955_v25 = vld [vmem:[#allocation8 + $0x1c4] sm:$0xf0] }
  0xe9   :  { %v1037_v29 = vmax.f32 %v684_v22, 0.0  ;;  %734 = vmatmul.bf16.gmra.mxu2 %v3270_v11  ;;  %832 = vmatmul.bf16.gmra.mxu0 %v3270_v11  ;;  %v657_v32 = vadd.f32 %v3317_v33, %v608_v17  ;;  %v2941_v17 = vld [vmem:[#allocation8 + $0x154] sm:$0xf0] }
  0xea   :  { %783 = vmatmul.bf16.gmra.mxu3 %v3272_v12 }
  0xeb   :  { %881 = vmatmul.bf16.gmra.mxu1 %v3272_v12  ;;  %v3359_v39 = vpack.c.bf16 %v1037_v29, %v1033_v28 }
  0xec   :  { %v637_v41 = vpop.f32.mrf.mxu2 }
  0xed   :  { %v638_v44 = vadd.f32 %v637_v41, %v3303_v61  ;;  %v686_v46 = vpop.f32.mrf.mxu3  ;;  %v997_v41 = vmax.f32 %v659_v31, 0.0  ;;  %v2957_v31 = vld [vmem:[#allocation8 + $0x1d4] sm:$0xf0] }
  0xee   :  { %v3364_v47 = vpop.f32.mrf.mxu0 }
  0xef   :  { %v687_v51 = vadd.f32 %v686_v46, %v638_v44  ;;  %v2741_v44 = vor.u32 %v2959_v43, %v2740_v19 }
  0xf0   :  { %v3366_v54 = vpop.f32.mrf.mxu1 }
  0xf1   :  { %v1041_v22 = vmax.f32 %v687_v51, 0.0  ;;  %1619 = vmatpush.bf16.msrb.mxu3 %v2741_v44 }
  0xf4   :  { %v639_v6 = vpop.f32.mrf.mxu2 }
  0xf5   :  { %v640_v58 = vadd.f32 %v639_v6, %v3303_v61  ;;  %v688_v21 = vpop.f32.mrf.mxu3  ;;  %v615_v6 = vadd.f32 %v3342_v60, %v3303_v61 }
  0xf6   :  { %v3371_v13 = vpop.f32.mrf.mxu0 }
  0xf7   :  { %v689_v15 = vadd.f32 %v688_v21, %v640_v58  ;;  %v664_v30 = vadd.f32 %v3344_v63, %v615_v6 }
  0xf8   :  { %v3373_v16 = vpop.f32.mrf.mxu1 }
  0xf9   :  { %v1045_v23 = vmax.f32 %v689_v15, 0.0  ;;  %895 = vmatmul.bf16.vlgmr.msra.gmra.mxu2 %v3232_v0  ;;  %1479 = vmatmul.bf16.vlgmr.msra.gmra.mxu0 %v3368_v8  ;;  %v2668_v15 = vld [vmem:[#allocation8 + $0x150] sm:$0xf] }
  0xfa   :  { %944 = vmatmul.bf16.vlgmr.msra.gmra.mxu3 %v3238_v7  ;;  %v993_v7 = vmax.f32 %v657_v32, 0.0  ;;  %v2732_v32 = vld [vmem:[#allocation8 + $0x1d0] sm:$0xf] }
  0xfb   :  { %v3382_v28 = vpack.c.bf16 %v1045_v23, %v1041_v22  ;;  %v2669_v22 = vor.u32 %v2941_v17, %v2668_v15 }
  0xfc   :  { %v700_v29 = vpop.f32.mrf.mxu2  ;;  %v3395_v55 = vpack.c.bf16 %v997_v41, %v993_v7 }
  0xfd   :  { %v749_v57 = vpop.f32.mrf.mxu3  ;;  %v701_v42 = vadd.f32 %v700_v29, %v3387_v5  ;;  %1571 = vmatpush.bf16.msrb.mxu2 %v2669_v22 }
  0xfe   :  { %v3389_v0 = vpop.f32.mrf.mxu0 }
  0xff   :  { %v750_v33 = vadd.f32 %v749_v57, %v701_v42  ;;  %v2733_v57 = vor.u32 %v2957_v31, %v2732_v32 }
 0x100   :  { %v3391_v34 = vpop.f32.mrf.mxu1 }
 0x101   :  { %v986_v58 = vmax.f32 %v750_v33, 0.0  ;;  %1620 = vmatpush.bf16.msrb.mxu3 %v2733_v57  ;;  %v620_v33 = vadd.f32 %v3364_v47, %v3303_v61 }
 0x104   :  { %v702_v46 = vpop.f32.mrf.mxu2 }
 0x105   :  { %v703_v9 = vadd.f32 %v702_v46, %v3387_v5  ;;  %v751_v51 = vpop.f32.mrf.mxu3  ;;  %v618_v46 = vadd.f32 %v3347_v20, %v3303_v61  ;;  %v669_v20 = vadd.f32 %v3366_v54, %v620_v33 }
 0x106   :  { %v3397_v59 = vpop.f32.mrf.mxu0 }
 0x107   :  { %v752_v62 = vadd.f32 %v751_v51, %v703_v9  ;;  %v667_v15 = vadd.f32 %v3351_v24, %v618_v46 }
 0x108   :  { %v3399_v2 = vpop.f32.mrf.mxu1 }
 0x109   :  { %v990_v21 = vmax.f32 %v752_v62, 0.0  ;;  %900 = vmatmul.bf16.gmra.mxu2 %v3244_v48  ;;  %1484 = vmatmul.bf16.gmra.mxu0 %v3395_v55  ;;  %v2660_v62 = vld [vmem:[#allocation8 + $0x140] sm:$0xf]  ;;  %v1009_v47 = vmax.f32 %v667_v15, 0.0 }
 0x10a   :  { %949 = vmatmul.bf16.gmra.mxu3 %v3250_v53  ;;  %v1005_v53 = vmax.f32 %v664_v30, 0.0 }
 0x10b   :  { %v3408_v18 = vpack.c.bf16 %v990_v21, %v986_v58  ;;  %v2661_v58 = vor.u32 %v2939_v3, %v2660_v62  ;;  %v2716_v62 = vld [vmem:[#allocation8 + $0x1b0] sm:$0xf]  ;;  %v2953_v3 = vld [vmem:[#allocation8 + $0x1b4] sm:$0xf0] }
 0x10c   :  { %v705_v23 = vpop.f32.mrf.mxu2  ;;  %v3419_v42 = vpack.c.bf16 %v1005_v53, %v1001_v27 }
 0x10d   :  { %v754_v26 = vpop.f32.mrf.mxu3  ;;  %1528 = vmatmul.bf16.vlgmr.msra.gmra.mxu1 %v3408_v18  ;;  %v706_v29 = vadd.f32 %v705_v23, %v3387_v5  ;;  %1572 = vmatpush.bf16.msrb.mxu2 %v2661_v58  ;;  %v2724_v23 = vld [vmem:[#allocation8 + $0x1c0] sm:$0xf]  ;;  %v2717_v58 = vor.u32 %v2953_v3, %v2716_v62  ;;  %v2951_v62 = vld [vmem:[#allocation8 + $0x1a4] sm:$0xf0] }
 0x10e   :  { %v3413_v60 = vpop.f32.mrf.mxu0  ;;  %v2725_v30 = vor.u32 %v2955_v25, %v2724_v23 }
 0x10f   :  { %v755_v35 = vadd.f32 %v754_v26, %v706_v29 }
 0x110   :  { %v3415_v48 = vpop.f32.mrf.mxu1  ;;  %1621 = vmatpush.bf16.msrb.mxu3 %v2725_v30 }
 0x111   :  { %v994_v9 = vmax.f32 %v755_v35, 0.0  ;;  %v2652_v35 = vld [vmem:[#allocation8 + $0x130] sm:$0xf] }
 0x114   :  { %v707_v7 = vpop.f32.mrf.mxu2  ;;  %1622 = vmatpush.bf16.msrb.mxu3 %v2717_v58 }
 0x115   :  { %v708_v63 = vadd.f32 %v707_v7, %v3387_v5  ;;  %v756_v41 = vpop.f32.mrf.mxu3 }
 0x116   :  { %v3421_v19 = vpop.f32.mrf.mxu0 }
 0x117   :  { %v757_v43 = vadd.f32 %v756_v41, %v708_v63  ;;  %v2937_v63 = vld [vmem:[#allocation8 + $0x134] sm:$0xf0] }
 0x118   :  { %v3423_v44 = vpop.f32.mrf.mxu1 }
 0x119   :  { %v998_v51 = vmax.f32 %v757_v43, 0.0  ;;  %905 = vmatmul.bf16.gmra.mxu2 %v3256_v36  ;;  %1489 = vmatmul.bf16.gmra.mxu0 %v3419_v42  ;;  %v2653_v43 = vor.u32 %v2937_v63, %v2652_v35  ;;  %v2550_v35 = vld [vmem:[#allocation8 + $0x68] sm:$0xf0] }
 0x11a   :  { %954 = vmatmul.bf16.gmra.mxu3 %v3262_v40  ;;  %v1013_v40 = vmax.f32 %v669_v20, 0.0 }
 0x11b   :  { %v3432_v6 = vpack.c.bf16 %v998_v51, %v994_v9  ;;  %1573 = vmatpush.bf16.msrb.mxu2 %v2653_v43 }
 0x11c   :  { %v710_v21 = vpop.f32.mrf.mxu2  ;;  %v3443_v53 = vpack.c.bf16 %v1013_v40, %v1009_v47  ;;  %v2912_v40 = vld [vmem:[#allocation8 + $0x74] sm:$0xf] }
 0x11d   :  { %v759_v17 = vpop.f32.mrf.mxu3  ;;  %1533 = vmatmul.bf16.gmra.mxu1 %v3432_v6  ;;  %v711_v22 = vadd.f32 %v710_v21, %v3387_v5 }
 0x11e   :  { %v3437_v61 = vpop.f32.mrf.mxu0 }
 0x11f   :  { %v760_v24 = vadd.f32 %v759_v17, %v711_v22  ;;  %v2558_v22 = vld [vmem:[#allocation8 + $0x78] sm:$0xf0] }
 0x120   :  { %v3439_v36 = vpop.f32.mrf.mxu1  ;;  %v2561_v30 = vor.u32 %v2912_v40, %v2558_v22 }
 0x121   :  { %v1002_v57 = vmax.f32 %v760_v24, 0.0  ;;  %v2644_v24 = vld [vmem:[#allocation8 + $0x120] sm:$0xf] }
 0x122   :  { %1667 = vmatpush.bf16.msrb.mxu0 %v2561_v30 }
 0x124   :  { %v712_v26 = vpop.f32.mrf.mxu2 }
 0x125   :  { %v713_v54 = vadd.f32 %v712_v26, %v3387_v5  ;;  %v761_v27 = vpop.f32.mrf.mxu3 }
 0x126   :  { %v3445_v29 = vpop.f32.mrf.mxu0 }
 0x127   :  { %v762_v32 = vadd.f32 %v761_v27, %v713_v54  ;;  %v2935_v54 = vld [vmem:[#allocation8 + $0x124] sm:$0xf0] }
 0x128   :  { %v3447_v31 = vpop.f32.mrf.mxu1 }
 0x129   :  { %v1006_v7 = vmax.f32 %v762_v32, 0.0  ;;  %910 = vmatmul.bf16.gmra.mxu2 %v3268_v10  ;;  %1494 = vmatmul.bf16.gmra.mxu0 %v3443_v53  ;;  %v2645_v32 = vor.u32 %v2935_v54, %v2644_v24  ;;  %v2904_v24 = vld [vmem:[#allocation8 + $0x34] sm:$0xf]  ;;  %v2526_v54 = vld [vmem:[#allocation8 + $0x38] sm:$0xf0] }
 0x12a   :  { %959 = vmatmul.bf16.gmra.mxu3 %v3274_v14 }
 0x12b   :  { %v3452_v41 = vpack.c.bf16 %v1006_v7, %v1002_v57  ;;  %v2910_v7 = vld [vmem:[#allocation8 + $0x64] sm:$0xf]  ;;  %1574 = vmatpush.bf16.msrb.mxu2 %v2645_v32 }
 0x12c   :  { %v715_v46 = vpop.f32.mrf.mxu2 }
 0x12d   :  { %v764_v33 = vpop.f32.mrf.mxu3  ;;  %1538 = vmatmul.bf16.gmra.mxu1 %v3452_v41  ;;  %v716_v10 = vadd.f32 %v715_v46, %v3387_v5  ;;  %v2542_v46 = vld [vmem:[#allocation8 + $0x58] sm:$0xf0] }
 0x12e   :  { %v3455_v9 = vpop.f32.mrf.mxu0 }
 0x12f   :  { %v765_v21 = vadd.f32 %v764_v33, %v716_v10  ;;  %v2708_v10 = vld [vmem:[#allocation8 + $0x1a0] sm:$0xf] }
 0x130   :  { %v3457_v51 = vpop.f32.mrf.mxu1  ;;  %v2709_v58 = vor.u32 %v2951_v62, %v2708_v10  ;;  %v2518_v10 = vld [vmem:[#allocation8 + $0x28] sm:$0xf0]  ;;  %v2928_v62 = vld [vmem:[#allocation8 + $0xf4] sm:$0xf] }
 0x131   :  { %v1010_v23 = vmax.f32 %v765_v21, 0.0 }
 0x132   :  { %1623 = vmatpush.bf16.msrb.mxu3 %v2709_v58  ;;  %v2622_v58 = vld [vmem:[#allocation8 + $0xf8] sm:$0xf0] }
 0x134   :  { %v717_v14 = vpop.f32.mrf.mxu2 }
 0x135   :  { %v718_v15 = vadd.f32 %v717_v14, %v3387_v5  ;;  %v766_v20 = vpop.f32.mrf.mxu3 }
 0x136   :  { %v3461_v17 = vpop.f32.mrf.mxu0 }
 0x137   :  { %v767_v47 = vadd.f32 %v766_v20, %v718_v15  ;;  %v2906_v15 = vld [vmem:[#allocation8 + $0x44] sm:$0xf]  ;;  %v2534_v20 = vld [vmem:[#allocation8 + $0x48] sm:$0xf0] }
 0x138   :  { %v3466_v26 = vpop.f32.mrf.mxu1 }
 0x139   :  { %v1014_v25 = vmax.f32 %v767_v47, 0.0  ;;  %915 = vmatmul.bf16.gmra.mxu2 %v3234_v1  ;;  %1499 = vmatmul.bf16.gmra.mxu0 %v3323_v50  ;;  %v2553_v1 = vor.u32 %v2910_v7, %v2550_v35  ;;  %v2529_v7 = vor.u32 %v2904_v24, %v2526_v54  ;;  %v2636_v35 = vld [vmem:[#allocation8 + $0x110] sm:$0xf] }
 0x13a   :  { %964 = vmatmul.bf16.gmra.mxu3 %v3236_v4  ;;  %v2908_v4 = vld [vmem:[#allocation8 + $0x54] sm:$0xf] }
 0x13b   :  { %v3468_v27 = vpack.c.bf16 %v1014_v25, %v1010_v23  ;;  %1668 = vmatpush.bf16.msrb.mxu0 %v2553_v1  ;;  %v2545_v3 = vor.u32 %v2908_v4, %v2542_v46  ;;  %v2537_v23 = vor.u32 %v2906_v15, %v2534_v20  ;;  %v2900_v20 = vld [vmem:[#allocation8 + $0x14] sm:$0xf] }
 0x13c   :  { %v720_v57 = vpop.f32.mrf.mxu2 }
 0x13d   :  { %v769_v63 = vpop.f32.mrf.mxu3  ;;  %1543 = vmatmul.bf16.gmra.mxu1 %v3468_v27  ;;  %v721_v33 = vadd.f32 %v720_v57, %v3387_v5 }
 0x13e   :  { %v3471_v43 = vpop.f32.mrf.mxu0 }
 0x13f   :  { %1669 = vmatpush.bf16.msrb.mxu0 %v2545_v3  ;;  %v770_v47 = vadd.f32 %v769_v63, %v721_v33  ;;  %v2933_v63 = vld [vmem:[#allocation8 + $0x114] sm:$0xf0]  ;;  %v2902_v33 = vld [vmem:[#allocation8 + $0x24] sm:$0xf] }
 0x140   :  { %v3474_v21 = vpop.f32.mrf.mxu1  ;;  %v2637_v4 = vor.u32 %v2933_v63, %v2636_v35  ;;  %v2628_v35 = vld [vmem:[#allocation8 + $0x100] sm:$0xf]  ;;  %v2931_v63 = vld [vmem:[#allocation8 + $0x104] sm:$0xf0] }
 0x141   :  { %v1018_v32 = vmax.f32 %v770_v47, 0.0  ;;  %v2510_v47 = vld [vmem:[#allocation8 + $0x18] sm:$0xf0] }
 0x142   :  { %1575 = vmatpush.bf16.msrb.mxu2 %v2637_v4  ;;  %v2513_v24 = vor.u32 %v2900_v20, %v2510_v47  ;;  %v2898_v4 = vld [vmem:[#allocation8 + $0x4] sm:$0xf] }
 0x143   :  { %1670 = vmatpush.bf16.msrb.mxu0 %v2537_v23  ;;  %v2700_v23 = vld [vmem:[#allocation8 + $0x190] sm:$0xf] }
 0x144   :  { %v722_v14 = vpop.f32.mrf.mxu2 }
 0x145   :  { %v723_v40 = vadd.f32 %v722_v14, %v3387_v5  ;;  %v771_v22 = vpop.f32.mrf.mxu3 }
 0x146   :  { %v3477_v25 = vpop.f32.mrf.mxu0 }
 0x147   :  { %v772_v30 = vadd.f32 %v771_v22, %v723_v40  ;;  %1671 = vmatpush.bf16.msrb.mxu0 %v2529_v7  ;;  %v2926_v40 = vld [vmem:[#allocation8 + $0xe4] sm:$0xf] }
 0x148   :  { %v3487_v15 = vpop.f32.mrf.mxu1 }
 0x149   :  { %v1022_v57 = vmax.f32 %v772_v30, 0.0  ;;  %920 = vmatmul.bf16.gmra.mxu2 %v3246_v49  ;;  %1504 = vmatmul.bf16.gmra.mxu0 %v3339_v45  ;;  %v2521_v49 = vor.u32 %v2902_v33, %v2518_v10  ;;  %v2949_v30 = vld [vmem:[#allocation8 + $0x194] sm:$0xf0] }
 0x14a   :  { %969 = vmatmul.bf16.gmra.mxu3 %v3248_v52  ;;  %v2625_v52 = vor.u32 %v2928_v62, %v2622_v58  ;;  %v2701_v54 = vor.u32 %v2949_v30, %v2700_v23  ;;  %v2502_v58 = vld [vmem:[#allocation8 + $0x8] sm:$0xf0]  ;;  %v2922_v30 = vld [vmem:[#allocation8 + $0xc4] sm:$0xf] }
 0x14b   :  { %v3482_v1 = vpack.c.bf16 %v1022_v57, %v1018_v32  ;;  %1672 = vmatpush.bf16.msrb.mxu0 %v2521_v49  ;;  %v2614_v32 = vld [vmem:[#allocation8 + $0xe8] sm:$0xf0]  ;;  %v2629_v49 = vor.u32 %v2931_v63, %v2628_v35  ;;  %v2505_v20 = vor.u32 %v2898_v4, %v2502_v58  ;;  %v2590_v35 = vld [vmem:[#allocation8 + $0xb8] sm:$0xf0] }
 0x14c   :  { %v725_v46 = vpop.f32.mrf.mxu2  ;;  %1716 = vmatpush.bf16.msrb.mxu1 %v2625_v52  ;;  %v2617_v57 = vor.u32 %v2926_v40, %v2614_v32  ;;  %1624 = vmatpush.bf16.msrb.mxu3 %v2701_v54  ;;  %v2606_v52 = vld [vmem:[#allocation8 + $0xd8] sm:$0xf0] }
 0x14d   :  { %3835 = vst [vmem:[#allocation16_spill] sm:$0xff] %v3482_v1  ;;  %v774_v3 = vpop.f32.mrf.mxu3  ;;  %1548 = vmatmul.bf16.gmra.mxu1 %v3482_v1  ;;  %v726_v22 = vadd.f32 %v725_v46, %v3387_v5  ;;  %v2924_v46 = vld [vmem:[#allocation8 + $0xd4] sm:$0xf]  ;;  %1576 = vmatpush.bf16.msrb.mxu2 %v2629_v49  ;;  %v2692_v49 = vld [vmem:[#allocation8 + $0x180] sm:$0xf] }
 0x14e   :  { %v3485_v14 = vpop.f32.mrf.mxu0  ;;  %v2609_v47 = vor.u32 %v2924_v46, %v2606_v52 }
 0x14f   :  { %1673 = vmatpush.bf16.msrb.mxu0 %v2513_v24  ;;  %v775_v33 = vadd.f32 %v774_v3, %v726_v22  ;;  %v2598_v24 = vld [vmem:[#allocation8 + $0xc8] sm:$0xf0] }
 0x150   :  { %1717 = vmatpush.bf16.msrb.mxu1 %v2617_v57  ;;  %v3493_v40 = vpop.f32.mrf.mxu1  ;;  %v2601_v54 = vor.u32 %v2922_v30, %v2598_v24  ;;  %v3507_v30 = vperm.slane %v3296_v56, 2 }
 0x151   :  { %v1026_v3 = vmax.f32 %v775_v33, 0.0 }
 0x153   :  { %1674 = vmatpush.bf16.msrb.mxu0 %v2505_v20 }
 0x154   :  { %v727_v7 = vpop.f32.mrf.mxu2  ;;  %1718 = vmatpush.bf16.msrb.mxu1 %v2609_v47  ;;  %v2916_v47 = vld [vmem:[#allocation8 + $0x94] sm:$0xf] }
 0x155   :  { %v728_v10 = vadd.f32 %v727_v7, %v3387_v5  ;;  %v776_v62 = vpop.f32.mrf.mxu3  ;;  %v2920_v7 = vld [vmem:[#allocation8 + $0xb4] sm:$0xf] }
 0x156   :  { %v3491_v1 = vpop.f32.mrf.mxu0  ;;  %v2593_v33 = vor.u32 %v2920_v7, %v2590_v35  ;;  %v2914_v35 = vld [vmem:[#allocation8 + $0x84] sm:$0xf] }
 0x157   :  { %v777_v23 = vadd.f32 %v776_v62, %v728_v10  ;;  %v2918_v10 = vld [vmem:[#allocation8 + $0xa4] sm:$0xf] }
 0x158   :  { %1719 = vmatpush.bf16.msrb.mxu1 %v2601_v54  ;;  %v3504_v58 = vpop.f32.mrf.mxu1 }
 0x159   :  { %v1030_v22 = vmax.f32 %v777_v23, 0.0  ;;  %925 = vmatmul.bf16.gmra.mxu2 %v3258_v37  ;;  %1509 = vmatmul.bf16.gmra.mxu0 %v3359_v39  ;;  %v2582_v37 = vld [vmem:[#allocation8 + $0xa8] sm:$0xf0]  ;;  %v2574_v23 = vld [vmem:[#allocation8 + $0x98] sm:$0xf0] }
 0x15a   :  { %974 = vmatmul.bf16.gmra.mxu3 %v3260_v38  ;;  %v2947_v38 = vld [vmem:[#allocation8 + $0x184] sm:$0xf0]  ;;  %v2585_v52 = vor.u32 %v2918_v10, %v2582_v37  ;;  %v801_v10 = vadd.f32 %v3389_v0, %v3507_v30 }
 0x15b   :  { %v3498_v32 = vpack.c.bf16 %v1030_v22, %v1026_v3  ;;  %v2693_v46 = vor.u32 %v2947_v38, %v2692_v49  ;;  %v2566_v49 = vld [vmem:[#allocation8 + $0x88] sm:$0xf0] }
 0x15c   :  { %v730_v57 = vpop.f32.mrf.mxu2  ;;  %1720 = vmatpush.bf16.msrb.mxu1 %v2593_v33  ;;  %v799_v33 = vadd.f32 %v3371_v13, %v3507_v30 }
 0x15d   :  { %v779_v63 = vpop.f32.mrf.mxu3  ;;  %1553 = vmatmul.bf16.gmra.mxu1 %v3498_v32  ;;  %v731_v62 = vadd.f32 %v730_v57, %v3387_v5  ;;  %1625 = vmatpush.bf16.msrb.mxu3 %v2693_v46  ;;  %v2577_v57 = vor.u32 %v2916_v47, %v2574_v23  ;;  %v2944_v46 = vld [vmem:[#allocation8 + $0x174] sm:$0xf]  ;;  %v850_v23 = vadd.f32 %v3391_v34, %v801_v10 }
 0x15e   :  { %v3501_v4 = vpop.f32.mrf.mxu0  ;;  %v848_v0 = vadd.f32 %v3373_v16, %v799_v33 }
 0x15f   :  { %v780_v24 = vadd.f32 %v779_v63, %v731_v62  ;;  %v2569_v63 = vor.u32 %v2914_v35, %v2566_v49 }
 0x160   :  { %1721 = vmatpush.bf16.msrb.mxu1 %v2585_v52  ;;  %v2686_v52 = vld [vmem:[#allocation8 + $0x178] sm:$0xf0]  ;;  %v3521_v47 = vpop.f32.mrf.mxu1 }
 0x161   :  { %v1034_v37 = vmax.f32 %v780_v24, 0.0  ;;  %v2689_v13 = vor.u32 %v2944_v46, %v2686_v52  ;;  %v804_v46 = vadd.f32 %v3397_v59, %v3507_v30  ;;  %v806_v52 = vadd.f32 %v3413_v60, %v3507_v30 }
 0x162   :  { %v3545_v59 = vperm.slane %v3296_v56, 3 }
 0x163   :  { %1765 = vmatpush.bf16.msra.mxu2 %v2689_v13 }
 0x164   :  { %v732_v20 = vpop.f32.mrf.mxu2  ;;  %1722 = vmatpush.bf16.msrb.mxu1 %v2577_v57  ;;  %v2960_v57 = vld [vmem:[#allocation8 + $0x1f4] sm:$0xf] }
 0x165   :  { %v733_v3 = vadd.f32 %v732_v20, %v3387_v5  ;;  %v781_v22 = vpop.f32.mrf.mxu3 }
 0x166   :  { %v3510_v54 = vpop.f32.mrf.mxu0 }
 0x167   :  { %v782_v7 = vadd.f32 %v781_v22, %v733_v3  ;;  %v991_v3 = vmax.f32 %v850_v23, 0.0  ;;  %v2678_v23 = vld [vmem:[#allocation8 + $0x168] sm:$0xf0] }
 0x168   :  { %1723 = vmatpush.bf16.msrb.mxu1 %v2569_v63  ;;  %v3532_v10 = vpop.f32.mrf.mxu1 }
 0x169   :  { %v1038_v38 = vmax.f32 %v782_v7, 0.0  ;;  %930 = vmatmul.bf16.gmra.mxu2 %v3270_v11  ;;  %1514 = vmatmul.bf16.gmra.mxu0 %v3382_v28  ;;  %v2750_v7 = vld [vmem:[#allocation8 + $0x1f8] sm:$0xf0] }
 0x16a   :  { %979 = vmatmul.bf16.gmra.mxu3 %v3272_v12  ;;  %v987_v12 = vmax.f32 %v848_v0, 0.0  ;;  %v2753_v35 = vor.u32 %v2960_v57, %v2750_v7 }
 0x16b   :  { %v3519_v62 = vpack.c.bf16 %v1038_v38, %v1034_v37 }
 0x16c   :  { %v735_v20 = vpop.f32.mrf.mxu2  ;;  %1814 = vmatpush.bf16.msra.mxu3 %v2753_v35  ;;  %v3529_v37 = vpack.c.bf16 %v991_v3, %v987_v12  ;;  %v853_v3 = vadd.f32 %v3399_v2, %v804_v46 }
 0x16d   :  { %v784_v24 = vpop.f32.mrf.mxu3  ;;  %1558 = vmatmul.bf16.gmra.mxu1 %v3519_v62  ;;  %v736_v22 = vadd.f32 %v735_v20, %v3387_v5 }
 0x16e   :  { %v3526_v11 = vpop.f32.mrf.mxu0  ;;  %v995_v7 = vmax.f32 %v853_v3, 0.0 }
 0x16f   :  { %v785_v16 = vadd.f32 %v784_v24, %v736_v22  ;;  %v855_v22 = vadd.f32 %v3415_v48, %v806_v52  ;;  %v2742_v48 = vld [vmem:[#allocation8 + $0x1e8] sm:$0xf0] }
 0x170   :  { %v3553_v57 = vpop.f32.mrf.mxu1 }
 0x171   :  { %v1042_v20 = vmax.f32 %v785_v16, 0.0  ;;  %v999_v35 = vmax.f32 %v855_v22, 0.0 }
 0x174   :  { %v737_v49 = vpop.f32.mrf.mxu2 }
 0x175   :  { %v738_v34 = vadd.f32 %v737_v49, %v3387_v5  ;;  %v786_v33 = vpop.f32.mrf.mxu3  ;;  %v2942_v5 = vld [vmem:[#allocation8 + $0x164] sm:$0xf] }
 0x176   :  { %v1480_v63 = vpop.f32.mrf.mxu0  ;;  %v2681_v12 = vor.u32 %v2942_v5, %v2678_v23  ;;  %v2958_v49 = vld [vmem:[#allocation8 + $0x1e4] sm:$0xf]  ;;  %v809_v23 = vadd.f32 %v3421_v19, %v3507_v30 }
 0x177   :  { %v787_v38 = vadd.f32 %v786_v33, %v738_v34  ;;  %v2745_v56 = vor.u32 %v2958_v49, %v2742_v48 }
 0x178   :  { %1766 = vmatpush.bf16.msra.mxu2 %v2681_v12  ;;  %v858_v19 = vadd.f32 %v3423_v44, %v809_v23 }
 0x179   :  { %v1046_v13 = vmax.f32 %v787_v38, 0.0  ;;  %1577 = vmatmul.bf16.vlgmr.msrb.gmra.mxu2 %v3529_v37  ;;  %1675 = vmatmul.bf16.vlgmr.msrb.gmra.mxu0 %v3368_v8  ;;  %v3551_v8 = vld [vmem:[%s3830_s4] sm:$0x3] }
 0x17a   :  { %v3557_v34 = vperm.slane %v3551_v8, 0  ;;  %1815 = vmatpush.bf16.msra.mxu3 %v2745_v56 }
 0x17b   :  { %v3540_v0 = vpack.c.bf16 %v1046_v13, %v1042_v20  ;;  %v3560_v20 = vpack.c.bf16 %v999_v35, %v995_v7  ;;  %v2940_v35 = vld [vmem:[#allocation8 + $0x154] sm:$0xf] }
 0x17c   :  { %v896_v24 = vpop.f32.mrf.mxu2  ;;  %v1481_v13 = vadd.f32 %v1480_v63, %v3557_v34  ;;  %v2670_v63 = vld [vmem:[#allocation8 + $0x158] sm:$0xf0] }
 0x17d   :  { %v945_v60 = vpop.f32.mrf.mxu3  ;;  %1563 = vmatmul.bf16.gmra.mxu1 %v3540_v0  ;;  %v897_v2 = vadd.f32 %v896_v24, %v3545_v59  ;;  %v811_v24 = vadd.f32 %v3437_v61, %v3507_v30  ;;  %v2673_v48 = vor.u32 %v2940_v35, %v2670_v63  ;;  %v814_v63 = vadd.f32 %v3445_v29, %v3507_v30 }
 0x17e   :  { %v1482_v16 = vpop.f32.mrf.mxu0 }
 0x17f   :  { %v946_v38 = vadd.f32 %v945_v60, %v897_v2  ;;  %v860_v61 = vadd.f32 %v3439_v36, %v811_v24  ;;  %1767 = vmatpush.bf16.msra.mxu2 %v2673_v48  ;;  %v863_v29 = vadd.f32 %v3447_v31, %v814_v63 }
 0x181   :  { %v988_v12 = vmax.f32 %v946_v38, 0.0  ;;  %v1007_v38 = vmax.f32 %v860_v61, 0.0 }
 0x184   :  { %v898_v33 = vpop.f32.mrf.mxu2 }
 0x185   :  { %v899_v46 = vadd.f32 %v898_v33, %v3545_v59  ;;  %v947_v52 = vpop.f32.mrf.mxu3  ;;  %v1003_v33 = vmax.f32 %v858_v19, 0.0 }
 0x186   :  { %v1485_v2 = vpop.f32.mrf.mxu0 }
 0x187   :  { %v948_v5 = vadd.f32 %v947_v52, %v899_v46  ;;  %v2956_v52 = vld [vmem:[#allocation8 + $0x1d4] sm:$0xf] }
 0x189   :  { %v992_v3 = vmax.f32 %v948_v5, 0.0  ;;  %1582 = vmatmul.bf16.gmra.mxu2 %v3560_v20  ;;  %1680 = vmatmul.bf16.gmra.mxu0 %v3395_v55  ;;  %v1483_v55 = vadd.f32 %v1482_v16, %v3557_v34  ;;  %v1486_v16 = vadd.f32 %v1485_v2, %v3557_v34  ;;  %v2662_v2 = vld [vmem:[#allocation8 + $0x148] sm:$0xf0] }
 0x18a   :  { %v1529_v22 = vpop.f32.mrf.mxu1 }
 0x18b   :  { %v3569_v60 = vpack.c.bf16 %v992_v3, %v988_v12  ;;  %v3571_v7 = vadd.f32 %v1529_v22, %v1481_v13  ;;  %v2734_v13 = vld [vmem:[#allocation8 + $0x1d8] sm:$0xf0] }
 0x18c   :  { %v901_v49 = vpop.f32.mrf.mxu2  ;;  %v2737_v12 = vor.u32 %v2956_v52, %v2734_v13 }
 0x18d   :  { %v950_v56 = vpop.f32.mrf.mxu3  ;;  %1626 = vmatmul.bf16.vlgmr.msrb.gmra.mxu3 %v3569_v60  ;;  %1724 = vmatmul.bf16.vlgmr.msrb.gmra.mxu1 %v3408_v18  ;;  %v902_v46 = vadd.f32 %v901_v49, %v3545_v59  ;;  %v3582_v18 = vpack.c.bf16 %v1007_v38, %v1003_v33  ;;  %v816_v49 = vadd.f32 %v3455_v9, %v3507_v30  ;;  %v2938_v33 = vld [vmem:[#allocation8 + $0x144] sm:$0xf] }
 0x18e   :  { %1816 = vmatpush.bf16.msra.mxu3 %v2737_v12  ;;  %v1487_v22 = vpop.f32.mrf.mxu0 }
 0x18f   :  { %v951_v36 = vadd.f32 %v950_v56, %v902_v46  ;;  %v2665_v46 = vor.u32 %v2938_v33, %v2662_v2  ;;  %v865_v52 = vadd.f32 %v3457_v51, %v816_v49 }
 0x191   :  { %v996_v48 = vmax.f32 %v951_v36, 0.0  ;;  %1768 = vmatpush.bf16.msra.mxu2 %v2665_v46  ;;  %v1015_v12 = vmax.f32 %v865_v52, 0.0  ;;  %v2954_v36 = vld [vmem:[#allocation8 + $0x1c4] sm:$0xf] }
 0x192   :  { %v1531_v5 = vpop.f32.mrf.mxu1 }
 0x193   :  { %v3579_v3 = vadd.f32 %v1531_v5, %v1483_v55  ;;  %v1011_v5 = vmax.f32 %v863_v29, 0.0 }
 0x194   :  { %v903_v44 = vpop.f32.mrf.mxu2 }
 0x195   :  { %v904_v23 = vadd.f32 %v903_v44, %v3545_v59  ;;  %v952_v24 = vpop.f32.mrf.mxu3  ;;  %v3604_v49 = vpack.c.bf16 %v1015_v12, %v1011_v5 }
 0x196   :  { %v1490_v13 = vpop.f32.mrf.mxu0 }
 0x197   :  { %v953_v35 = vadd.f32 %v952_v24, %v904_v23  ;;  %v2726_v23 = vld [vmem:[#allocation8 + $0x1c8] sm:$0xf0] }
 0x199   :  { %v1000_v19 = vmax.f32 %v953_v35, 0.0  ;;  %1587 = vmatmul.bf16.gmra.mxu2 %v3582_v18  ;;  %1685 = vmatmul.bf16.gmra.mxu0 %v3419_v42  ;;  %v1488_v42 = vadd.f32 %v1487_v22, %v3557_v34  ;;  %v1491_v22 = vadd.f32 %v1490_v13, %v3557_v34 }
 0x19a   :  { %v1534_v61 = vpop.f32.mrf.mxu1 }
 0x19b   :  { %v3591_v56 = vadd.f32 %v1534_v61, %v1486_v16  ;;  %v3593_v55 = vpack.c.bf16 %v1000_v19, %v996_v48  ;;  %v2729_v16 = vor.u32 %v2954_v36, %v2726_v23  ;;  %v819_v19 = vadd.f32 %v3461_v17, %v3507_v30 }
 0x19c   :  { %v906_v38 = vpop.f32.mrf.mxu2  ;;  %v821_v61 = vadd.f32 %v3471_v43, %v3507_v30 }
 0x19d   :  { %v955_v9 = vpop.f32.mrf.mxu3  ;;  %1631 = vmatmul.bf16.gmra.mxu3 %v3593_v55  ;;  %1729 = vmatmul.bf16.gmra.mxu1 %v3432_v6  ;;  %v907_v44 = vadd.f32 %v906_v38, %v3545_v59  ;;  %v868_v17 = vadd.f32 %v3466_v26, %v819_v19 }
 0x19e   :  { %1817 = vmatpush.bf16.msra.mxu3 %v2729_v16  ;;  %v1492_v38 = vpop.f32.mrf.mxu0  ;;  %v870_v43 = vadd.f32 %v3474_v21, %v821_v61  ;;  %v2718_v16 = vld [vmem:[#allocation8 + $0x1b8] sm:$0xf0] }
 0x19f   :  { %v956_v35 = vadd.f32 %v955_v9, %v907_v44  ;;  %v2936_v9 = vld [vmem:[#allocation8 + $0x134] sm:$0xf]  ;;  %v1019_v44 = vmax.f32 %v868_v17, 0.0  ;;  %v2646_v17 = vld [vmem:[#allocation8 + $0x128] sm:$0xf0] }
 0x1a0   :  { %v1023_v36 = vmax.f32 %v870_v43, 0.0 }
 0x1a1   :  { %v1004_v33 = vmax.f32 %v956_v35, 0.0 }
 0x1a2   :  { %v1536_v24 = vpop.f32.mrf.mxu1 }
 0x1a3   :  { %v3601_v31 = vadd.f32 %v1536_v24, %v1488_v42  ;;  %v2654_v42 = vld [vmem:[#allocation8 + $0x138] sm:$0xf0]  ;;  %v2952_v24 = vld [vmem:[#allocation8 + $0x1b4] sm:$0xf] }
 0x1a4   :  { %v908_v51 = vpop.f32.mrf.mxu2  ;;  %v2657_v5 = vor.u32 %v2936_v9, %v2654_v42  ;;  %v2721_v35 = vor.u32 %v2952_v24, %v2718_v16  ;;  %v2950_v16 = vld [vmem:[#allocation8 + $0x1a4] sm:$0xf] }
 0x1a5   :  { %v909_v63 = vadd.f32 %v908_v51, %v3545_v59  ;;  %v957_v6 = vpop.f32.mrf.mxu3 }
 0x1a6   :  { %1769 = vmatpush.bf16.msra.mxu2 %v2657_v5  ;;  %v1495_v26 = vpop.f32.mrf.mxu0  ;;  %1818 = vmatpush.bf16.msra.mxu3 %v2721_v35  ;;  %v2934_v5 = vld [vmem:[#allocation8 + $0x124] sm:$0xf] }
 0x1a7   :  { %v958_v48 = vadd.f32 %v957_v6, %v909_v63  ;;  %v1496_v19 = vadd.f32 %v1495_v26, %v3557_v34 }
 0x1a9   :  { %v1008_v2 = vmax.f32 %v958_v48, 0.0  ;;  %1592 = vmatmul.bf16.gmra.mxu2 %v3604_v49  ;;  %1690 = vmatmul.bf16.gmra.mxu0 %v3443_v53  ;;  %v1493_v53 = vadd.f32 %v1492_v38, %v3557_v34  ;;  %v3626_v48 = vpack.c.bf16 %v1023_v36, %v1019_v44 }
 0x1aa   :  { %v1539_v46 = vpop.f32.mrf.mxu1 }
 0x1ab   :  { %v3613_v29 = vadd.f32 %v1539_v46, %v1491_v22  ;;  %v3615_v52 = vpack.c.bf16 %v1008_v2, %v1004_v33  ;;  %v824_v33 = vadd.f32 %v3477_v25, %v3507_v30  ;;  %v826_v2 = vadd.f32 %v3485_v14, %v3507_v30 }
 0x1ac   :  { %v911_v13 = vpop.f32.mrf.mxu2 }
 0x1ad   :  { %v960_v12 = vpop.f32.mrf.mxu3  ;;  %1636 = vmatmul.bf16.gmra.mxu3 %v3615_v52  ;;  %1734 = vmatmul.bf16.gmra.mxu1 %v3452_v41  ;;  %v912_v23 = vadd.f32 %v911_v13, %v3545_v59  ;;  %v873_v25 = vadd.f32 %v3487_v15, %v824_v33 }
 0x1ae   :  { %v1497_v44 = vpop.f32.mrf.mxu0 }
 0x1af   :  { %v961_v6 = vadd.f32 %v960_v12, %v912_v23  ;;  %v2649_v12 = vor.u32 %v2934_v5, %v2646_v17  ;;  %v1027_v36 = vmax.f32 %v873_v25, 0.0 }
 0x1b1   :  { %v1012_v38 = vmax.f32 %v961_v6, 0.0  ;;  %1770 = vmatpush.bf16.msra.mxu2 %v2649_v12 }
 0x1b2   :  { %v1541_v51 = vpop.f32.mrf.mxu1 }
 0x1b3   :  { %v3623_v63 = vadd.f32 %v1541_v51, %v1493_v53  ;;  %v875_v53 = vadd.f32 %v3493_v40, %v826_v2  ;;  %v2710_v51 = vld [vmem:[#allocation8 + $0x1a8] sm:$0xf0] }
 0x1b4   :  { %v913_v21 = vpop.f32.mrf.mxu2  ;;  %v2713_v26 = vor.u32 %v2950_v16, %v2710_v51 }
 0x1b5   :  { %v914_v22 = vadd.f32 %v913_v21, %v3545_v59  ;;  %v962_v41 = vpop.f32.mrf.mxu3  ;;  %v1031_v23 = vmax.f32 %v875_v53, 0.0 }
 0x1b6   :  { %1819 = vmatpush.bf16.msra.mxu3 %v2713_v26 }
 0x1b7   :  { %v963_v61 = vadd.f32 %v962_v41, %v914_v22  ;;  %v3648_v22 = vpack.c.bf16 %v1031_v23, %v1027_v36  ;;  %v2930_v23 = vld [vmem:[#allocation8 + $0x104] sm:$0xf] }
 0x1b9   :  { %v1016_v46 = vmax.f32 %v963_v61, 0.0  ;;  %1597 = vmatmul.bf16.gmra.mxu2 %v3626_v48  ;;  %1695 = vmatmul.bf16.gmra.mxu0 %v3323_v50  ;;  %v1498_v50 = vadd.f32 %v1497_v44, %v3557_v34  ;;  %v831_v61 = vadd.f32 %v3501_v4, %v3507_v30  ;;  %v3836_v4 = vld [vmem:[#allocation16_spill] sm:$0xff]  ;;  %v2702_v44 = vld [vmem:[#allocation8 + $0x198] sm:$0xf0] }
 0x1ba   :  { %v1544_v9 = vpop.f32.mrf.mxu1 }
 0x1bb   :  { %v3635_v42 = vadd.f32 %v1544_v9, %v1496_v19  ;;  %v3637_v13 = vpack.c.bf16 %v1016_v46, %v1012_v38  ;;  %v829_v19 = vadd.f32 %v3491_v1, %v3507_v30  ;;  %v2932_v46 = vld [vmem:[#allocation8 + $0x114] sm:$0xf]  ;;  %v2638_v9 = vld [vmem:[#allocation8 + $0x118] sm:$0xf0]  ;;  %v880_v12 = vadd.f32 %v3521_v47, %v831_v61 }
 0x1bc   :  { %v916_v43 = vpop.f32.mrf.mxu2  ;;  %v2641_v17 = vor.u32 %v2932_v46, %v2638_v9  ;;  %v2969_v46 = vld [vmem:[#allocation10 + $0x38] sm:$0xff] }
 0x1bd   :  { %v965_v14 = vpop.f32.mrf.mxu3  ;;  %1641 = vmatmul.bf16.gmra.mxu3 %v3637_v13  ;;  %1739 = vmatmul.bf16.gmra.mxu1 %v3468_v27  ;;  %v917_v24 = vadd.f32 %v916_v43, %v3545_v59  ;;  %v878_v43 = vadd.f32 %v3504_v58, %v829_v19  ;;  %v1039_v53 = vmax.f32 %v880_v12, 0.0 }
 0x1be   :  { %1771 = vmatpush.bf16.msra.mxu2 %v2641_v17  ;;  %2043 = vmatpush.bf16.msra.mxu0 %v2969_v46  ;;  %v2968_v17 = vld [vmem:[#allocation10 + $0x30] sm:$0xff] }
 0x1bf   :  { %v966_v21 = vadd.f32 %v965_v14, %v917_v24  ;;  %v1035_v25 = vmax.f32 %v878_v43, 0.0  ;;  %v2948_v14 = vld [vmem:[#allocation8 + $0x194] sm:$0xf]  ;;  %v2630_v24 = vld [vmem:[#allocation8 + $0x108] sm:$0xf0] }
 0x1c1   :  { %v1020_v33 = vmax.f32 %v966_v21, 0.0  ;;  %v3664_v51 = vpack.c.bf16 %v1039_v53, %v1035_v25  ;;  %v836_v21 = vadd.f32 %v3526_v11, %v3507_v30 }
 0x1c2   :  { %v1546_v35 = vpop.f32.mrf.mxu1  ;;  %2044 = vmatpush.bf16.msra.mxu0 %v2968_v17 }
 0x1c3   :  { %v3645_v15 = vadd.f32 %v1546_v35, %v1498_v50  ;;  %v2705_v50 = vor.u32 %v2948_v14, %v2702_v44  ;;  %v2633_v35 = vor.u32 %v2930_v23, %v2630_v24  ;;  %v2966_v14 = vld [vmem:[#allocation10 + $0x20] sm:$0xff]  ;;  %v2964_v24 = vld [vmem:[#allocation10 + $0x10] sm:$0xff] }
 0x1c4   :  { %v918_v40 = vpop.f32.mrf.mxu2 }
 0x1c5   :  { %v919_v6 = vadd.f32 %v918_v40, %v3545_v59  ;;  %v967_v27 = vpop.f32.mrf.mxu3  ;;  %1820 = vmatpush.bf16.msra.mxu3 %v2705_v50  ;;  %1772 = vmatpush.bf16.msra.mxu2 %v2633_v35  ;;  %v834_v40 = vadd.f32 %v3510_v54, %v3507_v30  ;;  %v2946_v54 = vld [vmem:[#allocation8 + $0x184] sm:$0xf]  ;;  %v2694_v30 = vld [vmem:[#allocation8 + $0x188] sm:$0xf0] }
 0x1c6   :  { %v2697_v11 = vor.u32 %v2946_v54, %v2694_v30 }
 0x1c7   :  { %v968_v41 = vadd.f32 %v967_v27, %v919_v6  ;;  %v883_v61 = vadd.f32 %v3532_v10, %v834_v40  ;;  %v3690_v40 = vpop.f32.mrf.mxu0 }
 0x1c9   :  { %v1024_v2 = vmax.f32 %v968_v41, 0.0  ;;  %1602 = vmatmul.bf16.gmra.mxu2 %v3648_v22  ;;  %1700 = vmatmul.bf16.gmra.mxu0 %v3339_v45  ;;  %v1043_v9 = vmax.f32 %v883_v61, 0.0 }
 0x1ca   :  { %1821 = vmatpush.bf16.msra.mxu3 %v2697_v11 }
 0x1cb   :  { %v3656_v38 = vpack.c.bf16 %v1024_v2, %v1020_v33  ;;  %v885_v33 = vadd.f32 %v3553_v57, %v836_v21 }
 0x1cc   :  { %v921_v5 = vpop.f32.mrf.mxu2 }
 0x1cd   :  { %v970_v1 = vpop.f32.mrf.mxu3  ;;  %1646 = vmatmul.bf16.gmra.mxu3 %v3656_v38  ;;  %1744 = vmatmul.bf16.gmra.mxu1 %v3836_v4  ;;  %v922_v45 = vadd.f32 %v921_v5, %v3545_v59  ;;  %v1047_v5 = vmax.f32 %v885_v33, 0.0  ;;  %v2967_v4 = vld [vmem:[#allocation10 + $0x28] sm:$0xff] }
 0x1ce   :  { %2045 = vmatpush.bf16.msra.mxu0 %v2967_v4 }
 0x1cf   :  { %v971_v58 = vadd.f32 %v970_v1, %v922_v45  ;;  %v3680_v1 = vpack.c.bf16 %v1047_v5, %v1043_v9  ;;  %v3697_v61 = vpop.f32.mrf.mxu0 }
 0x1d1   :  { %v1028_v6 = vmax.f32 %v971_v58, 0.0 }
 0x1d2   :  { %2046 = vmatpush.bf16.msra.mxu0 %v2966_v14 }
 0x1d4   :  { %v923_v36 = vpop.f32.mrf.mxu2 }
 0x1d5   :  { %v924_v47 = vadd.f32 %v923_v36, %v3545_v59  ;;  %v972_v16 = vpop.f32.mrf.mxu3  ;;  %v2965_v36 = vld [vmem:[#allocation10 + $0x18] sm:$0xff] }
 0x1d6   :  { %2047 = vmatpush.bf16.msra.mxu0 %v2965_v36 }
 0x1d7   :  { %v973_v26 = vadd.f32 %v972_v16, %v924_v47  ;;  %v3700_v54 = vpop.f32.mrf.mxu0 }
 0x1d9   :  { %v1032_v27 = vmax.f32 %v973_v26, 0.0  ;;  %1607 = vmatmul.bf16.gmra.mxu2 %v3664_v51  ;;  %1705 = vmatmul.bf16.gmra.mxu0 %v3359_v39  ;;  %v2963_v26 = vld [vmem:[#allocation10 + $0x8] sm:$0xff] }
 0x1da   :  { %2048 = vmatpush.bf16.msra.mxu0 %v2964_v24 }
 0x1db   :  { %v3672_v41 = vpack.c.bf16 %v1032_v27, %v1028_v6  ;;  %v2962_v27 = vld [vmem:[#allocation10] sm:$0xff] }
 0x1dc   :  { %v926_v19 = vpop.f32.mrf.mxu2 }
 0x1dd   :  { %v975_v2 = vpop.f32.mrf.mxu3  ;;  %1651 = vmatmul.bf16.gmra.mxu3 %v3672_v41  ;;  %1749 = vmatmul.bf16.gmra.mxu1 %v3498_v32  ;;  %v927_v39 = vadd.f32 %v926_v19, %v3545_v59 }
 0x1de   :  { %2049 = vmatpush.bf16.msra.mxu0 %v2963_v26 }
 0x1df   :  { %v976_v10 = vadd.f32 %v975_v2, %v927_v39 }
 0x1e1   :  { %v1036_v25 = vmax.f32 %v976_v10, 0.0  ;;  %v3708_v10 = vpop.f32.mrf.mxu1 }
 0x1e2   :  { %2050 = vmatpush.bf16.msra.mxu0 %v2962_v27 }
 0x1e4   :  { %v928_v43 = vpop.f32.mrf.mxu2 }
 0x1e5   :  { %v929_v57 = vadd.f32 %v928_v43, %v3545_v59  ;;  %v977_v12 = vpop.f32.mrf.mxu3 }
 0x1e7   :  { %v978_v32 = vadd.f32 %v977_v12, %v929_v57  ;;  %v2975_v12 = vld [vmem:[#allocation10 + $0x68] sm:$0xff] }
 0x1e9   :  { %v1040_v53 = vmax.f32 %v978_v32, 0.0  ;;  %1612 = vmatmul.bf16.gmra.mxu2 %v3680_v1  ;;  %1710 = vmatmul.bf16.gmra.mxu0 %v3382_v28 }
 0x1eb   :  { %v3684_v45 = vpack.c.bf16 %v1040_v53, %v1036_v25  ;;  %v1551_v25 = vpop.f32.mrf.mxu1 }
 0x1ec   :  { %v931_v44 = vpop.f32.mrf.mxu2 }
 0x1ed   :  { %v980_v50 = vpop.f32.mrf.mxu3  ;;  %1656 = vmatmul.bf16.gmra.mxu3 %v3684_v45  ;;  %1754 = vmatmul.bf16.gmra.mxu1 %v3519_v62  ;;  %v932_v23 = vadd.f32 %v931_v44, %v3545_v59 }
 0x1ef   :  { %v981_v47 = vadd.f32 %v980_v50, %v932_v23 }
 0x1f1   :  { %v1044_v21 = vmax.f32 %v981_v47, 0.0 }
 0x1f3   :  { %v3719_v47 = vpop.f32.mrf.mxu1 }
 0x1f4   :  { %v933_v58 = vpop.f32.mrf.mxu2 }
 0x1f5   :  { %v934_v28 = vadd.f32 %v933_v58, %v3545_v59  ;;  %v982_v16 = vpop.f32.mrf.mxu3  ;;  %v2977_v59 = vld [vmem:[#allocation10 + $0x78] sm:$0xff]  ;;  %v2974_v58 = vld [vmem:[#allocation10 + $0x60] sm:$0xff] }
 0x1f6   :  { %2092 = vmatpush.bf16.msra.mxu1 %v2977_v59 }
 0x1f7   :  { %v983_v35 = vadd.f32 %v982_v16, %v934_v28 }
 0x1f9   :  { %v1048_v6 = vmax.f32 %v983_v35, 0.0  ;;  %1773 = vmatmul.bf16.vlgmr.msra.gmra.mxu2 %v3529_v37  ;;  %v2976_v37 = vld [vmem:[#allocation10 + $0x70] sm:$0xff] }
 0x1fa   :  { %2093 = vmatpush.bf16.msra.mxu1 %v2976_v37 }
 0x1fb   :  { %v3693_v62 = vpack.c.bf16 %v1048_v6, %v1044_v21 }
 0x1fc   :  { %v1578_v19 = vpop.f32.mrf.mxu2 }
 0x1fd   :  { %1661 = vmatmul.bf16.gmra.mxu3 %v3693_v62  ;;  %1759 = vmatmul.bf16.gmra.mxu1 %v3540_v0  ;;  %v1579_v46 = vadd.f32 %v1578_v19, %v3571_v7  ;;  %v3704_v0 = vpop.f32.mrf.mxu0 }
 0x1fe   :  { %2094 = vmatpush.bf16.msra.mxu1 %v2975_v12 }
 0x202   :  { %2095 = vmatpush.bf16.msra.mxu1 %v2974_v58 }
 0x204   :  { %v1580_v33 = vpop.f32.mrf.mxu2 }
 0x205   :  { %v1581_v9 = vadd.f32 %v1580_v33, %v3579_v3  ;;  %v3711_v32 = vpop.f32.mrf.mxu0 }
 0x209   :  { %1778 = vmatmul.bf16.gmra.mxu2 %v3560_v20 }
 0x20c   :  { %v1583_v2 = vpop.f32.mrf.mxu2 }
 0x20d   :  { %1822 = vmatmul.bf16.vlgmr.msra.gmra.mxu3 %v3569_v60  ;;  %v1584_v4 = vadd.f32 %v1583_v2, %v3591_v56  ;;  %v3716_v50 = vpop.f32.mrf.mxu0  ;;  %v2973_v2 = vld [vmem:[#allocation10 + $0x58] sm:$0xff] }
 0x20e   :  { %2096 = vmatpush.bf16.msra.mxu1 %v2973_v2 }
 0x210   :  { %v1627_v30 = vpop.f32.mrf.mxu3 }
 0x211   :  { %v1628_v5 = vadd.f32 %v1627_v30, %v1579_v46 }
 0x213   :  { %v1863_v20 = vmax.f32 %v1628_v5, 0.0 }
 0x214   :  { %v1585_v11 = vpop.f32.mrf.mxu2 }
 0x215   :  { %v3721_v28 = vpop.f32.mrf.mxu0 }
 0x218   :  { %v1629_v39 = vpop.f32.mrf.mxu3 }
 0x219   :  { %v1630_v17 = vadd.f32 %v1629_v39, %v1581_v9  ;;  %1783 = vmatmul.bf16.gmra.mxu2 %v3582_v18  ;;  %v1586_v18 = vadd.f32 %v1585_v11, %v3601_v31 }
 0x21b   :  { %v1865_v43 = vmax.f32 %v1630_v17, 0.0 }
 0x21c   :  { %v1588_v60 = vpop.f32.mrf.mxu2 }
 0x21d   :  { %v1895_v57 = vpack.c.bf16 %v1865_v43, %v1863_v20  ;;  %1827 = vmatmul.bf16.gmra.mxu3 %v3593_v55  ;;  %v1589_v16 = vadd.f32 %v1588_v60, %v3613_v29  ;;  %v3727_v33 = vpop.f32.mrf.mxu0  ;;  %v2972_v60 = vld [vmem:[#allocation10 + $0x50] sm:$0xff] }
 0x21e   :  { %2097 = vmatpush.bf16.msra.mxu1 %v2972_v60 }
 0x21f   :  { %2051 = vmatmul.bf16.vlgmr.msra.gmra.mxu0 %v1895_v57 }
 0x220   :  { %v1632_v7 = vpop.f32.mrf.mxu3 }
 0x221   :  { %v1633_v53 = vadd.f32 %v1632_v7, %v1584_v4 }
 0x223   :  { %v1867_v55 = vmax.f32 %v1633_v53, 0.0 }
 0x224   :  { %v1590_v3 = vpop.f32.mrf.mxu2 }
 0x225   :  { %v3733_v9 = vpop.f32.mrf.mxu0 }
 0x228   :  { %v1634_v14 = vpop.f32.mrf.mxu3 }
 0x229   :  { %v1635_v44 = vadd.f32 %v1634_v14, %v1586_v18  ;;  %1788 = vmatmul.bf16.gmra.mxu2 %v3604_v49  ;;  %v1591_v49 = vadd.f32 %v1590_v3, %v3623_v63 }
 0x22b   :  { %v1869_v36 = vmax.f32 %v1635_v44, 0.0 }
 0x22c   :  { %v1593_v23 = vpop.f32.mrf.mxu2 }
 0x22d   :  { %1832 = vmatmul.bf16.gmra.mxu3 %v3615_v52  ;;  %v1897_v24 = vpack.c.bf16 %v1869_v36, %v1867_v55  ;;  %v1556_v52 = vpop.f32.mrf.mxu1  ;;  %v1594_v30 = vadd.f32 %v1593_v23, %v3635_v42  ;;  %v1501_v42 = vadd.f32 %v3690_v40, %v3557_v34 }
 0x22f   :  { %2056 = vmatmul.bf16.gmra.mxu0 %v1897_v24  ;;  %v1550_v12 = vadd.f32 %v3708_v10, %v1501_v42  ;;  %v2971_v10 = vld [vmem:[#allocation10 + $0x48] sm:$0xff] }
 0x230   :  { %v1637_v56 = vpop.f32.mrf.mxu3  ;;  %2098 = vmatpush.bf16.msra.mxu1 %v2971_v10 }
 0x231   :  { %v1638_v35 = vadd.f32 %v1637_v56, %v1589_v16  ;;  %v1508_v56 = vadd.f32 %v3704_v0, %v3557_v34  ;;  %v2970_v0 = vld [vmem:[#allocation10 + $0x40] sm:$0xff] }
 0x233   :  { %v1871_v6 = vmax.f32 %v1638_v35, 0.0  ;;  %v1557_v16 = vadd.f32 %v1556_v52, %v1508_v56  ;;  %v1511_v52 = vadd.f32 %v3711_v32, %v3557_v34 }
 0x234   :  { %v1595_v31 = vpop.f32.mrf.mxu2  ;;  %2099 = vmatpush.bf16.msra.mxu1 %v2970_v0 }
 0x235   :  { %v3729_v29 = vpop.f32.mrf.mxu1 }
 0x238   :  { %v1639_v26 = vpop.f32.mrf.mxu3 }
 0x239   :  { %v1640_v21 = vadd.f32 %v1639_v26, %v1591_v49  ;;  %1793 = vmatmul.bf16.gmra.mxu2 %v3626_v48  ;;  %v1596_v48 = vadd.f32 %v1595_v31, %v3645_v15  ;;  %v1503_v15 = vadd.f32 %v3697_v61, %v3557_v34 }
 0x23b   :  { %v1873_v27 = vmax.f32 %v1640_v21, 0.0  ;;  %v1552_v3 = vadd.f32 %v1551_v25, %v1503_v15  ;;  %v1506_v25 = vadd.f32 %v3700_v54, %v3557_v34 }
 0x23c   :  { %v1598_v19 = vpop.f32.mrf.mxu2 }
 0x23d   :  { %1837 = vmatmul.bf16.gmra.mxu3 %v3637_v13  ;;  %v1899_v59 = vpack.c.bf16 %v1873_v27, %v1871_v6  ;;  %v1561_v43 = vpop.f32.mrf.mxu1  ;;  %v1599_v4 = vadd.f32 %v1598_v19, %v1550_v12 }
 0x23f   :  { %2061 = vmatmul.bf16.gmra.mxu0 %v1899_v59 }
 0x240   :  { %v1642_v37 = vpop.f32.mrf.mxu3 }
 0x241   :  { %v1643_v11 = vadd.f32 %v1642_v37, %v1594_v30 }
 0x243   :  { %v1875_v13 = vmax.f32 %v1643_v11, 0.0 }
 0x244   :  { %v1600_v63 = vpop.f32.mrf.mxu2 }
 0x245   :  { %v1564_v53 = vpop.f32.mrf.mxu1 }
 0x248   :  { %v1644_v46 = vpop.f32.mrf.mxu3 }
 0x249   :  { %v1645_v5 = vadd.f32 %v1644_v46, %v1596_v48  ;;  %1798 = vmatmul.bf16.gmra.mxu2 %v3648_v22  ;;  %v3742_v22 = vpop.f32.mrf.mxu0 }
 0x24b   :  { %v1877_v39 = vmax.f32 %v1645_v5, 0.0 }
 0x24c   :  { %v1603_v17 = vpop.f32.mrf.mxu2 }
 0x24d   :  { %1842 = vmatmul.bf16.gmra.mxu3 %v3656_v38  ;;  %v1901_v20 = vpack.c.bf16 %v1877_v39, %v1875_v13  ;;  %v1601_v38 = vadd.f32 %v1600_v63, %v1552_v3  ;;  %v1566_v58 = vpop.f32.mrf.mxu1  ;;  %v1513_v63 = vadd.f32 %v3716_v50, %v3557_v34 }
 0x24f   :  { %2066 = vmatmul.bf16.gmra.mxu0 %v1901_v20  ;;  %v1562_v48 = vadd.f32 %v1561_v43, %v1513_v63  ;;  %v1518_v43 = vadd.f32 %v3727_v33, %v3557_v34 }
 0x250   :  { %v1647_v57 = vpop.f32.mrf.mxu3 }
 0x251   :  { %v1648_v18 = vadd.f32 %v1647_v57, %v1599_v4  ;;  %v3745_v23 = vpop.f32.mrf.mxu0 }
 0x253   :  { %v1879_v55 = vmax.f32 %v1648_v18, 0.0 }
 0x254   :  { %v1605_v7 = vpop.f32.mrf.mxu2 }
 0x255   :  { %v1606_v26 = vadd.f32 %v1605_v7, %v1557_v16  ;;  %v1725_v19 = vpop.f32.mrf.mxu1  ;;  %v1567_v7 = vadd.f32 %v1566_v58, %v1518_v43 }
 0x258   :  { %v1649_v14 = vpop.f32.mrf.mxu3 }
 0x259   :  { %v1650_v44 = vadd.f32 %v1649_v14, %v1601_v38  ;;  %1803 = vmatmul.bf16.gmra.mxu2 %v3664_v51  ;;  %v1555_v51 = vadd.f32 %v3719_v47, %v1506_v25  ;;  %v3753_v35 = vpop.f32.mrf.mxu0 }
 0x25b   :  { %v1881_v40 = vmax.f32 %v1650_v44, 0.0  ;;  %v1604_v49 = vadd.f32 %v1603_v17, %v1555_v51 }
 0x25c   :  { %v1608_v36 = vpop.f32.mrf.mxu2 }
 0x25d   :  { %v1903_v61 = vpack.c.bf16 %v1881_v40, %v1879_v55  ;;  %1847 = vmatmul.bf16.gmra.mxu3 %v3672_v41  ;;  %v1727_v46 = vpop.f32.mrf.mxu1 }
 0x25f   :  { %2071 = vmatmul.bf16.gmra.mxu0 %v1903_v61  ;;  %v3774_v61 = vperm.slane %v3551_v8, 1 }
 0x260   :  { %v1652_v24 = vpop.f32.mrf.mxu3 }
 0x261   :  { %v1653_v41 = vadd.f32 %v1652_v24, %v1604_v49  ;;  %v3759_v37 = vpop.f32.mrf.mxu0  ;;  %v1677_v33 = vadd.f32 %v3733_v9, %v3774_v61  ;;  %v1682_v9 = vadd.f32 %v3745_v23, %v3774_v61 }
 0x262   :  { %v1687_v23 = vadd.f32 %v3759_v37, %v3774_v61 }
 0x263   :  { %v1883_v27 = vmax.f32 %v1653_v41, 0.0  ;;  %v1726_v24 = vadd.f32 %v1725_v19, %v1677_v33 }
 0x264   :  { %v1610_v31 = vpop.f32.mrf.mxu2 }
 0x265   :  { %v1611_v5 = vadd.f32 %v1610_v31, %v1562_v48  ;;  %v1730_v50 = vpop.f32.mrf.mxu1 }
 0x266   :  { %v1731_v19 = vadd.f32 %v1730_v50, %v1682_v9 }
 0x268   :  { %v1654_v21 = vpop.f32.mrf.mxu3 }
 0x269   :  { %v1655_v6 = vadd.f32 %v1654_v21, %v1606_v26  ;;  %1808 = vmatmul.bf16.gmra.mxu2 %v3680_v1  ;;  %v1560_v1 = vadd.f32 %v3729_v29, %v1511_v52  ;;  %v3764_v17 = vpop.f32.mrf.mxu0  ;;  %v1516_v29 = vadd.f32 %v3721_v28, %v3557_v34 }
 0x26b   :  { %v1885_v54 = vmax.f32 %v1655_v6, 0.0  ;;  %v1609_v11 = vadd.f32 %v1608_v36, %v1560_v1  ;;  %v1565_v15 = vadd.f32 %v1564_v53, %v1516_v29  ;;  %v1679_v53 = vadd.f32 %v3742_v22, %v3774_v61 }
 0x26c   :  { %v1613_v59 = vpop.f32.mrf.mxu2  ;;  %v1684_v22 = vadd.f32 %v3753_v35, %v3774_v61 }
 0x26d   :  { %v1905_v2 = vpack.c.bf16 %v1885_v54, %v1883_v27  ;;  %1852 = vmatmul.bf16.gmra.mxu3 %v3684_v45  ;;  %v1614_v4 = vadd.f32 %v1613_v59, %v1565_v15  ;;  %v1728_v56 = vadd.f32 %v1727_v46, %v1679_v53 }
 0x26f   :  { %2076 = vmatmul.bf16.gmra.mxu0 %v1905_v2 }
 0x270   :  { %v1657_v47 = vpop.f32.mrf.mxu3 }
 0x271   :  { %v1658_v45 = vadd.f32 %v1657_v47, %v1609_v11  ;;  %v3771_v3 = vpop.f32.mrf.mxu0 }
 0x273   :  { %v1887_v20 = vmax.f32 %v1658_v45, 0.0 }
 0x274   :  { %v1615_v30 = vpop.f32.mrf.mxu2 }
 0x275   :  { %v1616_v38 = vadd.f32 %v1615_v30, %v1567_v7 }
 0x278   :  { %v1659_v13 = vpop.f32.mrf.mxu3 }
 0x279   :  { %v1660_v39 = vadd.f32 %v1659_v13, %v1611_v5  ;;  %v1693_v10 = vpop.f32.mrf.mxu0 }
 0x27b   :  { %v1889_v32 = vmax.f32 %v1660_v39, 0.0  ;;  %v1689_v39 = vadd.f32 %v3764_v17, %v3774_v61  ;;  %v1692_v17 = vadd.f32 %v3771_v3, %v3774_v61 }
 0x27c   :  { %v1774_v60 = vpop.f32.mrf.mxu2 }
 0x27d   :  { %v1907_v57 = vpack.c.bf16 %v1889_v32, %v1887_v20  ;;  %1857 = vmatmul.bf16.gmra.mxu3 %v3693_v62  ;;  %v1732_v62 = vpop.f32.mrf.mxu1  ;;  %v1775_v51 = vadd.f32 %v1774_v60, %v1726_v24 }
 0x27e   :  { %v1733_v2 = vadd.f32 %v1732_v62, %v1684_v22 }
 0x27f   :  { %2081 = vmatmul.bf16.gmra.mxu0 %v1907_v57 }
 0x280   :  { %v1662_v42 = vpop.f32.mrf.mxu3 }
 0x281   :  { %v1663_v18 = vadd.f32 %v1662_v42, %v1614_v4  ;;  %v1696_v46 = vpop.f32.mrf.mxu0 }
 0x282   :  { %v1697_v3 = vadd.f32 %v1696_v46, %v3774_v61 }
 0x283   :  { %v1891_v55 = vmax.f32 %v1663_v18, 0.0 }
 0x284   :  { %v1776_v12 = vpop.f32.mrf.mxu2 }
 0x285   :  { %v1735_v25 = vpop.f32.mrf.mxu1  ;;  %v1777_v31 = vadd.f32 %v1776_v12, %v1728_v56 }
 0x286   :  { %v1736_v20 = vadd.f32 %v1735_v25, %v1687_v23 }
 0x288   :  { %v1664_v14 = vpop.f32.mrf.mxu3 }
 0x289   :  { %v1665_v44 = vadd.f32 %v1664_v14, %v1616_v38  ;;  %v1698_v50 = vpop.f32.mrf.mxu0 }
 0x28b   :  { %v1893_v40 = vmax.f32 %v1665_v44, 0.0  ;;  %v1694_v44 = vadd.f32 %v1693_v10, %v3774_v61  ;;  %v1699_v10 = vadd.f32 %v1698_v50, %v3774_v61 }
 0x28c   :  { %v1779_v36 = vpop.f32.mrf.mxu2 }
 0x28d   :  { %v1909_v28 = vpack.c.bf16 %v1893_v40, %v1891_v55  ;;  %v1737_v27 = vpop.f32.mrf.mxu1  ;;  %v1780_v0 = vadd.f32 %v1779_v36, %v1731_v19 }
 0x28e   :  { %v1738_v60 = vadd.f32 %v1737_v27, %v1689_v39 }
 0x28f   :  { %2086 = vmatmul.bf16.gmra.mxu0 %v1909_v28 }
 0x290   :  { %v1823_v34 = vpop.f32.mrf.mxu3 }
 0x291   :  { %v1824_v16 = vadd.f32 %v1823_v34, %v1775_v51  ;;  %v1701_v37 = vpop.f32.mrf.mxu0 }
 0x293   :  { %v1864_v26 = vmax.f32 %v1824_v16, 0.0 }
 0x294   :  { %v1781_v58 = vpop.f32.mrf.mxu2 }
 0x295   :  { %v1782_v47 = vadd.f32 %v1781_v58, %v1733_v2  ;;  %v1740_v63 = vpop.f32.mrf.mxu1 }
 0x296   :  { %v1741_v62 = vadd.f32 %v1740_v63, %v1692_v17  ;;  %v1702_v63 = vadd.f32 %v1701_v37, %v3774_v61 }
 0x298   :  { %v1825_v49 = vpop.f32.mrf.mxu3 }
 0x299   :  { %v1826_v8 = vadd.f32 %v1825_v49, %v1777_v31  ;;  %v1703_v25 = vpop.f32.mrf.mxu0 }
 0x29b   :  { %v1866_v41 = vmax.f32 %v1826_v8, 0.0 }
 0x29c   :  { %v1784_v21 = vpop.f32.mrf.mxu2 }
 0x29d   :  { %v1896_v6 = vpack.c.bf16 %v1866_v41, %v1864_v26  ;;  %v1742_v35 = vpop.f32.mrf.mxu1  ;;  %v1785_v57 = vadd.f32 %v1784_v21, %v1736_v20 }
 0x29e   :  { %v1743_v55 = vadd.f32 %v1742_v35, %v1694_v44 }
 0x29f   :  { %2100 = vmatmul.bf16.vlgmr.msra.gmra.mxu1 %v1896_v6 }
 0x2a0   :  { %v1828_v54 = vpop.f32.mrf.mxu3 }
 0x2a1   :  { %v1829_v52 = vadd.f32 %v1828_v54, %v1780_v0  ;;  %v1706_v26 = vpop.f32.mrf.mxu0 }
 0x2a3   :  { %v1868_v48 = vmax.f32 %v1829_v52, 0.0 }
 0x2a4   :  { %v1786_v59 = vpop.f32.mrf.mxu2 }
 0x2a5   :  { %v1787_v42 = vadd.f32 %v1786_v59, %v1738_v60  ;;  %v1745_v4 = vpop.f32.mrf.mxu1 }
 0x2a6   :  { %v1746_v8 = vadd.f32 %v1745_v4, %v1697_v3 }
 0x2a8   :  { %v1830_v1 = vpop.f32.mrf.mxu3 }
 0x2a9   :  { %v1831_v30 = vadd.f32 %v1830_v1, %v1782_v47  ;;  %v1708_v47 = vpop.f32.mrf.mxu0  ;;  %v1704_v1 = vadd.f32 %v1703_v25, %v3774_v61 }
 0x2ab   :  { %v1870_v11 = vmax.f32 %v1831_v30, 0.0 }
 0x2ac   :  { %v1789_v5 = vpop.f32.mrf.mxu2 }
 0x2ad   :  { %v1898_v45 = vpack.c.bf16 %v1870_v11, %v1868_v48  ;;  %v1790_v40 = vadd.f32 %v1789_v5, %v1741_v62  ;;  %v1747_v36 = vpop.f32.mrf.mxu1 }
 0x2ae   :  { %v1748_v41 = vadd.f32 %v1747_v36, %v1699_v10 }
 0x2af   :  { %2105 = vmatmul.bf16.gmra.mxu1 %v1898_v45 }
 0x2b0   :  { %v1833_v13 = vpop.f32.mrf.mxu3 }
 0x2b1   :  { %v1834_v29 = vadd.f32 %v1833_v13, %v1785_v57  ;;  %v1711_v23 = vpop.f32.mrf.mxu0 }
 0x2b3   :  { %v1872_v12 = vmax.f32 %v1834_v29, 0.0  ;;  %v1707_v29 = vadd.f32 %v1706_v26, %v3774_v61 }
 0x2b4   :  { %v1791_v32 = vpop.f32.mrf.mxu2 }
 0x2b5   :  { %v1792_v28 = vadd.f32 %v1791_v32, %v1743_v55  ;;  %v1750_v31 = vpop.f32.mrf.mxu1 }
 0x2b6   :  { %v1751_v30 = vadd.f32 %v1750_v31, %v1702_v63 }
 0x2b8   :  { %v1835_v43 = vpop.f32.mrf.mxu3 }
 0x2b9   :  { %v1836_v15 = vadd.f32 %v1835_v43, %v1787_v42  ;;  %v1713_v43 = vpop.f32.mrf.mxu0 }
 0x2bb   :  { %v1874_v7 = vmax.f32 %v1836_v15, 0.0  ;;  %v1709_v15 = vadd.f32 %v1708_v47, %v3774_v61 }
 0x2bc   :  { %v1794_v18 = vpop.f32.mrf.mxu2 }
 0x2bd   :  { %v1900_v38 = vpack.c.bf16 %v1874_v7, %v1872_v12  ;;  %v1795_v21 = vadd.f32 %v1794_v18, %v1746_v8  ;;  %v1752_v22 = vpop.f32.mrf.mxu1 }
 0x2be   :  { %v1753_v11 = vadd.f32 %v1752_v22, %v1704_v1 }
 0x2bf   :  { %2110 = vmatmul.bf16.gmra.mxu1 %v1900_v38 }
 0x2c0   :  { %v1838_v14 = vpop.f32.mrf.mxu3 }
 0x2c1   :  { %v1839_v34 = vadd.f32 %v1838_v14, %v1790_v40  ;;  %v2052_v44 = vpop.f32.mrf.mxu0 }
 0x2c3   :  { %v1876_v58 = vmax.f32 %v1839_v34, 0.0  ;;  %v1712_v34 = vadd.f32 %v1711_v23, %v3774_v61 }
 0x2c4   :  { %v1796_v33 = vpop.f32.mrf.mxu2 }
 0x2c5   :  { %v1797_v6 = vadd.f32 %v1796_v33, %v1748_v41  ;;  %v1755_v48 = vpop.f32.mrf.mxu1 }
 0x2c6   :  { %v1756_v12 = vadd.f32 %v1755_v48, %v1707_v29 }
 0x2c8   :  { %v1840_v53 = vpop.f32.mrf.mxu3 }
 0x2c9   :  { %v1841_v24 = vadd.f32 %v1840_v53, %v1792_v28  ;;  %v1714_v53 = vadd.f32 %v1713_v43, %v3774_v61  ;;  %v2054_v25 = vpop.f32.mrf.mxu0 }
 0x2cb   :  { %v1878_v56 = vmax.f32 %v1841_v24, 0.0 }
 0x2cc   :  { %v1799_v49 = vpop.f32.mrf.mxu2 }
 0x2cd   :  { %v1902_v51 = vpack.c.bf16 %v1878_v56, %v1876_v58  ;;  %v1800_v46 = vadd.f32 %v1799_v49, %v1751_v30  ;;  %v1757_v57 = vpop.f32.mrf.mxu1 }
 0x2ce   :  { %v1758_v7 = vadd.f32 %v1757_v57, %v1709_v15 }
 0x2cf   :  { %2115 = vmatmul.bf16.gmra.mxu1 %v1902_v51 }
 0x2d0   :  { %v1843_v16 = vpop.f32.mrf.mxu3 }
 0x2d1   :  { %v1844_v27 = vadd.f32 %v1843_v16, %v1795_v21  ;;  %v2057_v41 = vpop.f32.mrf.mxu0  ;;  %v3802_v21 = vld [vmem:[%s3832_s6] ss:$0 sm:$0xff]  ;;  %s3170_s6 = smov [#allocation11]  }
 0x2d2   :  { %v2055_v22 = vadd.f32 %v3802_v21, %v2054_v25  ;;  %s2161_s30 = sshll.u32 %s3170_s6, 4  ;;  %s2162_s30 = int_to_ptr.vmem [resolvable:$true] %s2161_s30 }
 0x2d3   :  { %v1880_v19 = vmax.f32 %v1844_v27, 0.0 }
 0x2d4   :  { %v1801_v2 = vpop.f32.mrf.mxu2 }
 0x2d5   :  { %v1802_v45 = vadd.f32 %v1801_v2, %v1753_v11  ;;  %v1760_v37 = vpop.f32.mrf.mxu1  ;;  %v2058_v2 = vadd.f32 %v3802_v21, %v2057_v41 }
 0x2d6   :  { %v1761_v24 = vadd.f32 %v1760_v37, %v1712_v34 }
 0x2d8   :  { %v1845_v54 = vpop.f32.mrf.mxu3 }
 0x2d9   :  { %v1846_v9 = vadd.f32 %v1845_v54, %v1797_v6  ;;  %v2059_v61 = vpop.f32.mrf.mxu0  ;;  %v2053_v6 = vadd.f32 %v3802_v21, %v2052_v44 }
 0x2da   :  { %v2060_v63 = vadd.f32 %v3802_v21, %v2059_v61 }
 0x2db   :  { %v1882_v59 = vmax.f32 %v1846_v9, 0.0 }
 0x2dc   :  { %v1804_v5 = vpop.f32.mrf.mxu2 }
 0x2dd   :  { %v1904_v0 = vpack.c.bf16 %v1882_v59, %v1880_v19  ;;  %v1805_v4 = vadd.f32 %v1804_v5, %v1756_v12  ;;  %v1762_v33 = vpop.f32.mrf.mxu1 }
 0x2de   :  { %v1763_v56 = vadd.f32 %v1762_v33, %v1714_v53 }
 0x2df   :  { %2120 = vmatmul.bf16.gmra.mxu1 %v1904_v0 }
 0x2e0   :  { %v1848_v52 = vpop.f32.mrf.mxu3 }
 0x2e1   :  { %v1849_v13 = vadd.f32 %v1848_v52, %v1800_v46  ;;  %v2062_v9 = vpop.f32.mrf.mxu0 }
 0x2e2   :  { %v2063_v11 = vadd.f32 %v3802_v21, %v2062_v9 }
 0x2e3   :  { %v1884_v20 = vmax.f32 %v1849_v13, 0.0 }
 0x2e4   :  { %v1806_v50 = vpop.f32.mrf.mxu2 }
 0x2e5   :  { %v1807_v38 = vadd.f32 %v1806_v50, %v1758_v7 }
 0x2e8   :  { %v1850_v35 = vpop.f32.mrf.mxu3 }
 0x2e9   :  { %v1851_v39 = vadd.f32 %v1850_v35, %v1802_v45  ;;  %v2064_v0 = vpop.f32.mrf.mxu0 }
 0x2ea   :  { %v2065_v13 = vadd.f32 %v3802_v21, %v2064_v0 }
 0x2eb   :  { %v1886_v32 = vmax.f32 %v1851_v39, 0.0 }
 0x2ec   :  { %v1809_v62 = vpop.f32.mrf.mxu2 }
 0x2ed   :  { %v1906_v60 = vpack.c.bf16 %v1886_v32, %v1884_v20  ;;  %v1810_v51 = vadd.f32 %v1809_v62, %v1761_v24 }
 0x2ef   :  { %2125 = vmatmul.bf16.gmra.mxu1 %v1906_v60 }
 0x2f0   :  { %v1853_v42 = vpop.f32.mrf.mxu3 }
 0x2f1   :  { %v1854_v18 = vadd.f32 %v1853_v42, %v1805_v4  ;;  %v2067_v48 = vpop.f32.mrf.mxu0 }
 0x2f2   :  { %v2068_v20 = vadd.f32 %v3802_v21, %v2067_v48 }
 0x2f3   :  { %v1888_v55 = vmax.f32 %v1854_v18, 0.0 }
 0x2f4   :  { %v1811_v58 = vpop.f32.mrf.mxu2 }
 0x2f5   :  { %v1812_v31 = vadd.f32 %v1811_v58, %v1763_v56 }
 0x2f8   :  { %v1855_v14 = vpop.f32.mrf.mxu3 }
 0x2f9   :  { %v1856_v17 = vadd.f32 %v1855_v14, %v1807_v38  ;;  %v2069_v45 = vpop.f32.mrf.mxu0 }
 0x2fa   :  { %v2070_v57 = vadd.f32 %v3802_v21, %v2069_v45 }
 0x2fb   :  { %v1890_v40 = vmax.f32 %v1856_v17, 0.0 }
 0x2fd   :  { %v1908_v36 = vpack.c.bf16 %v1890_v40, %v1888_v55 }
 0x2ff   :  { %2130 = vmatmul.bf16.gmra.mxu1 %v1908_v36 }
 0x300   :  { %v1858_v28 = vpop.f32.mrf.mxu3 }
 0x301   :  { %v1859_v16 = vadd.f32 %v1858_v28, %v1810_v51  ;;  %v2072_v39 = vpop.f32.mrf.mxu0 }
 0x302   :  { %v2073_v43 = vadd.f32 %v3802_v21, %v2072_v39 }
 0x303   :  { %v1892_v10 = vmax.f32 %v1859_v16, 0.0 }
 0x308   :  { %v1860_v3 = vpop.f32.mrf.mxu3 }
 0x309   :  { %v1861_v49 = vadd.f32 %v1860_v3, %v1812_v31  ;;  %v2074_v50 = vpop.f32.mrf.mxu0 }
 0x30a   :  { %v2075_v4 = vadd.f32 %v3802_v21, %v2074_v50 }
 0x30b   :  { %v1894_v8 = vmax.f32 %v1861_v49, 0.0 }
 0x30d   :  { %v1910_v26 = vpack.c.bf16 %v1894_v8, %v1892_v10 }
 0x30f   :  { %2135 = vmatmul.bf16.gmra.mxu1 %v1910_v26 }
 0x311   :  { %v2077_v7 = vpop.f32.mrf.mxu0 }
 0x312   :  { %v2078_v14 = vadd.f32 %v3802_v21, %v2077_v7 }
 0x319   :  { %v2079_v37 = vpop.f32.mrf.mxu0 }
 0x31a   :  { %v2080_v55 = vadd.f32 %v3802_v21, %v2079_v37 }
 0x31c   :  { %v2101_v27 = vpop.f32.mrf.mxu1 }
 0x31d   :  { %v2102_v54 = vadd.f32 %v2101_v27, %v2053_v6 }
 0x31f   :  { %2141 = vst [vmem:[#allocation11] sm:$0xff] %v2102_v54 }
 0x321   :  { %v2082_v62 = vpop.f32.mrf.mxu0 }
 0x322   :  { %v2083_v28 = vadd.f32 %v3802_v21, %v2082_v62 }
 0x324   :  { %v2103_v19 = vpop.f32.mrf.mxu1 }
 0x325   :  { %v2104_v59 = vadd.f32 %v2103_v19, %v2055_v22 }
 0x327   :  { %2142 = vst [vmem:[#allocation11 + $0x8] sm:$0xff] %v2104_v59 }
 0x329   :  { %v2084_v34 = vpop.f32.mrf.mxu0 }
 0x32a   :  { %v2085_v24 = vadd.f32 %v3802_v21, %v2084_v34 }
 0x32c   :  { %v2106_v47 = vpop.f32.mrf.mxu1 }
 0x32d   :  { %v2107_v52 = vadd.f32 %v2106_v47, %v2058_v2 }
 0x32f   :  { %2143 = vst [vmem:[#allocation11 + $0x10] sm:$0xff] %v2107_v52 }
 0x331   :  { %v2087_v56 = vpop.f32.mrf.mxu0 }
 0x332   :  { %v2088_v51 = vadd.f32 %v3802_v21, %v2087_v56 }
 0x334   :  { %v2108_v1 = vpop.f32.mrf.mxu1 }
 0x335   :  { %v2109_v30 = vadd.f32 %v2108_v1, %v2060_v63 }
 0x337   :  { %2144 = vst [vmem:[#allocation11 + $0x18] sm:$0xff] %v2109_v30 }
 0x339   :  { %v2089_v3 = vpop.f32.mrf.mxu0 }
 0x33a   :  { %v2090_v49 = vadd.f32 %v3802_v21, %v2089_v3 }
 0x33c   :  { %v2111_v46 = vpop.f32.mrf.mxu1 }
 0x33d   :  { %v2112_v5 = vadd.f32 %v2111_v46, %v2063_v11 }
 0x33f   :  { %2145 = vst [vmem:[#allocation11 + $0x20] sm:$0xff] %v2112_v5 }
 0x344   :  { %v2113_v23 = vpop.f32.mrf.mxu1 }
 0x345   :  { %v2114_v35 = vadd.f32 %v2113_v23, %v2065_v13 }
 0x347   :  { %2146 = vst [vmem:[#allocation11 + $0x28] sm:$0xff] %v2114_v35 }
 0x34c   :  { %v2116_v32 = vpop.f32.mrf.mxu1 }
 0x34d   :  { %v2117_v60 = vadd.f32 %v2116_v32, %v2068_v20 }
 0x34f   :  { %2147 = vst [vmem:[#allocation11 + $0x30] sm:$0xff] %v2117_v60 }
 0x354   :  { %v2118_v42 = vpop.f32.mrf.mxu1 }
 0x355   :  { %v2119_v29 = vadd.f32 %v2118_v42, %v2070_v57 }
 0x357   :  { %2148 = vst [vmem:[#allocation11 + $0x38] sm:$0xff] %v2119_v29 }
 0x35c   :  { %v2121_v15 = vpop.f32.mrf.mxu1 }
 0x35d   :  { %v2122_v12 = vadd.f32 %v2121_v15, %v2073_v43 }
 0x35f   :  { %2149 = vst [vmem:[#allocation11 + $0x40] sm:$0xff] %v2122_v12 }
 0x364   :  { %v2123_v38 = vpop.f32.mrf.mxu1 }
 0x365   :  { %v2124_v18 = vadd.f32 %v2123_v38, %v2075_v4 }
 0x367   :  { %2150 = vst [vmem:[#allocation11 + $0x48] sm:$0xff] %v2124_v18 }
 0x36c   :  { %v2126_v17 = vpop.f32.mrf.mxu1 }
 0x36d   :  { %v2127_v44 = vadd.f32 %v2126_v17, %v2078_v14 }
 0x36f   :  { %2151 = vst [vmem:[#allocation11 + $0x50] sm:$0xff] %v2127_v44 }
 0x374   :  { %v2128_v40 = vpop.f32.mrf.mxu1 }
 0x375   :  { %v2129_v36 = vadd.f32 %v2128_v40, %v2080_v55 }
 0x377   :  { %2152 = vst [vmem:[#allocation11 + $0x58] sm:$0xff] %v2129_v36 }
 0x37c   :  { %v2131_v33 = vpop.f32.mrf.mxu1 }
 0x37d   :  { %v2132_v53 = vadd.f32 %v2131_v33, %v2083_v28 }
 0x37f   :  { %2153 = vst [vmem:[#allocation11 + $0x60] sm:$0xff] %v2132_v53 }
 0x384   :  { %v2133_v25 = vpop.f32.mrf.mxu1 }
 0x385   :  { %v2134_v58 = vadd.f32 %v2133_v25, %v2085_v24 }
 0x387   :  { %2154 = vst [vmem:[#allocation11 + $0x68] sm:$0xff] %v2134_v58 }
 0x38c   :  { %v2136_v31 = vpop.f32.mrf.mxu1 }
 0x38d   :  { %v2137_v16 = vadd.f32 %v2136_v31, %v2088_v51 }
 0x38f   :  { %2155 = vst [vmem:[#allocation11 + $0x70] sm:$0xff] %v2137_v16 }
 0x394   :  { %v2138_v10 = vpop.f32.mrf.mxu1 }
 0x395   :  { %v2139_v8 = vadd.f32 %v2138_v10, %v2090_v49 }
 0x397   :  { %2156 = vst [vmem:[#allocation11 + $0x78] sm:$0xff] %v2139_v8 }
 0x398   :  { %2169 = dma.vmem_to_hbm [thread:$0]  %s2162_s30, 2048, %s2164_s10, [#allocation4], %s3163_s1, %s3163_s1, %s3164_s16  }
 0x399   :  { %3157 = dma.done.wait [#allocation4], 2048  }
 0x39a   :  { %3158 = vsyncadd [#allocation4], 4294965248 }
 0x39b   :  { %2174 = vsyncpa [#allocation3], 1 }
 0x39c   :  { %2175 = vsyncpa [#allocation6], 1 }
 0x39d   :  { %2176 = vsyncpa [#allocation9], 1 }
 0x39e   :  { %2177 = vsyncpa [#allocation4], 1 }

</bundles_post_ra>
